<compile_context>
chip_gen: v7x
topology: tpu7x:2x2x1
jax: 0.10.0
libtpu: 0.0.40
codegen_flags: <defaults>
</compile_context>

<pallas_src>
from functools import partial

import numpy as np

import jax
import jax.numpy as jnp
from jax import lax
from jax.experimental import pallas as pl
from jax.experimental.pallas import tpu as pltpu


# ----------------------------------------------------------------------------
# Fused Pallas kernel: conv1 -> pool -> conv2 -> pool -> fc1 -> fc2 -> fc3
# ----------------------------------------------------------------------------
def _lenet5_kernel(x_ref, b1w_ref, b1b_ref, b2w_ref, b2b_ref,
                   fw1_ref, fb1_ref, fw2_ref, fb2_ref, fw3_ref, fb3_ref,
                   o_ref):
    f32, bf16 = jnp.float32, jnp.bfloat16
    nb = x_ref.shape[0]
    x = x_ref[...]                                              # (nb, 28, 28) f32

    # ---- conv1 (1->6, 5x5, valid) + ReLU: single im2col MXU dot, K = 5*28 = 140.
    # lhs rows = (n, oh); slab columns = ow*6 + co.
    lhs1 = jnp.concatenate([x[:, di:di + 24, :] for di in range(5)],
                           axis=-1).reshape(nb * 24, 140)
    y = jnp.dot(lhs1.astype(bf16), b1w_ref[...],
                preferred_element_type=f32)                     # (nb*24, 144)
    y = jnp.maximum(y + b1b_ref[...], 0.0)

    # ---- 2x2/2 max-pool.  H: pairwise sublane max.  W: shifted lane max
    # (roll-by-6 written as slice+concat, width stays 144).  Valid pooled pixel
    # (w, ci) sits at lane 12*w + ci; every other 6-lane group (and the wrapped
    # tail) is garbage and gets zero rows in b2w.
    y = y.reshape(nb, 12, 2, 144)
    y = jnp.maximum(y[:, :, 0], y[:, :, 1])                     # (nb, 12, 144)
    p1 = jnp.maximum(y, jnp.concatenate([y[..., 6:], y[..., :6]], axis=-1))

    # ---- conv2 (6->16, 5x5, valid) + ReLU: single im2col MXU dot, K = 5*144 = 720.
    # Output columns = ow*16 + co (lane dense, 128).
    lhs2 = jnp.concatenate([p1[:, di:di + 8, :] for di in range(5)],
                           axis=-1).reshape(nb * 8, 720)
    y = jnp.dot(lhs2.astype(bf16), b2w_ref[...],
                preferred_element_type=f32)                     # (nb*8, 128)
    y = jnp.maximum(y + b2b_ref[...], 0.0)

    # ---- 2x2/2 max-pool: valid pooled pixel (w, co) at lane 32*w + co.
    y = y.reshape(nb, 4, 2, 128)
    y = jnp.maximum(y[:, :, 0], y[:, :, 1])                     # (nb, 4, 128)
    p2 = jnp.maximum(y, jnp.concatenate([y[..., 16:], y[..., :16]], axis=-1))

    # ---- fc1 (256->120, padded to 128 output lanes): one K=512 dot.  The
    # lane-aligned concat flattens the 4 pooled rows; garbage lanes hit zero
    # rows of fw1.
    h = jnp.concatenate([p2[:, hh, :] for hh in range(4)], axis=-1)   # (nb, 512)
    h = jnp.dot(h.astype(bf16), fw1_ref[...], preferred_element_type=f32)
    h = jnp.maximum(h + fb1_ref[...], 0.0)                      # (nb, 128)

    # ---- fc2 (120->84) and fc3 (84->10), both padded to 128 lanes (lane-dense
    # output store; wrapper slices [:, :10]).
    h = jnp.dot(h.astype(bf16), fw2_ref[...], preferred_element_type=f32)
    h = jnp.maximum(h + fb2_ref[...], 0.0)                      # (nb, 128)
    h = jnp.dot(h.astype(bf16), fw3_ref[...], preferred_element_type=f32)
    o_ref[...] = jnp.maximum(h + fb3_ref[...], 0.0)             # final ReLU per spec


# ----------------------------------------------------------------------------
# pallas_call wrapper: batch grid, weights resident, pipelined I/O
# ----------------------------------------------------------------------------
_WEIGHT_KEYS = ("b1w", "b1b", "b2w", "b2b", "fw1", "fb1", "fw2", "fb2", "fw3", "fb3")


@partial(jax.jit, static_argnames=("nb",))
def lenet5_forward(x_nchw, kp, nb=128):
    assert x_nchw.shape[1:] == (1, 28, 28), x_nchw.shape
    N = x_nchw.shape[0]
    nb = max(1, min(nb, N))                       # batch tile (VMEM-safe default)
    x = x_nchw.reshape(N, 28, 28).astype(jnp.float32)   # Cin == 1: metadata-only
    n_pad = (-N) % nb
    if n_pad:
        x = jnp.pad(x, ((0, n_pad), (0, 0), (0, 0)))
    Np = N + n_pad
    grid = (Np // nb,)

    weights = [kp[k] for k in _WEIGHT_KEYS]       # all 2-D packed slabs / biases

    # Advisory cost estimate so XLA schedules neighbours around the custom call.
    flops = 2 * Np * (24 * 140 * 144 + 8 * 720 * 128
                      + 512 * 128 + 128 * 128 + 128 * 128)
    bytes_accessed = int(x.size * 4 + Np * 128 * 4
                         + sum(int(np.prod(w.shape)) * w.dtype.itemsize
                               for w in weights))

    out = pl.pallas_call(
        _lenet5_kernel,
        out_shape=jax.ShapeDtypeStruct((Np, 128), jnp.float32),
        grid=grid,
        in_specs=([pl.BlockSpec((nb, 28, 28), lambda i: (i, 0, 0))]
                  + [pl.BlockSpec(w.shape, lambda i: (0, 0)) for w in weights]),
        out_specs=pl.BlockSpec((nb, 128), lambda i: (i, 0)),
        compiler_params=pltpu.CompilerParams(dimension_semantics=("parallel",)),
        cost_estimate=pl.CostEstimate(flops=flops, transcendentals=0,
                                      bytes_accessed=bytes_accessed),
    )(x, *weights)
    return out[:N, :10]


# ----------------------------------------------------------------------------
# One-time weight repacking (hoisted out of the per-call path), bf16 slabs
# ----------------------------------------------------------------------------
def prepare_params(p):
    c1w = np.asarray(p["conv1_w"], np.float32)   # (6, 1, 5, 5)   OIHW
    c1b = np.asarray(p["conv1_b"], np.float32)
    c2w = np.asarray(p["conv2_w"], np.float32)   # (16, 6, 5, 5)
    c2b = np.asarray(p["conv2_b"], np.float32)
    f1w = np.asarray(p["fc1_w"], np.float32)     # (120, 256), cols in (c, h, w) order
    f1b = np.asarray(p["fc1_b"], np.float32)
    f2w = np.asarray(p["fc2_w"], np.float32)     # (84, 120)
    f2b = np.asarray(p["fc2_b"], np.float32)
    f3w = np.asarray(p["fc3_w"], np.float32)     # (10, 84)
    f3b = np.asarray(p["fc3_b"], np.float32)

    # conv1 im2col slab (140, 144): row di*28 + (ow+dj), col ow*6 + co.
    b1w = np.zeros((140, 144), np.float32)
    for di in range(5):
        for ow in range(24):
            for dj in range(5):
                b1w[di * 28 + ow + dj, ow * 6:(ow + 1) * 6] = c1w[:, 0, di, dj]
    b1b = np.tile(c1b, 24)[None, :]                              # (1, 144)

    # conv2 im2col slab (720, 128) over the un-compacted pooled-1 lanes:
    # pooled pixel (ww, ci) lives at lane 12*ww + ci of p1; all other lanes
    # (garbage / wrapped) keep zero rows.
    b2w = np.zeros((720, 128), np.float32)
    for di in range(5):
        for ow in range(8):
            for dj in range(5):
                for ci in range(6):
                    b2w[di * 144 + 12 * (ow + dj) + ci,
                        ow * 16:(ow + 1) * 16] = c2w[:, ci, di, dj]
    b2b = np.tile(c2b, 8)[None, :]                               # (1, 128)

    # fc1 slab (512, 128): flattened p2 lane index h*128 + 32*w + co holds pooled
    # pixel (co, h, w); PyTorch flatten of (N,16,4,4) is index co*16 + h*4 + w.
    # Garbage lanes keep zero rows; outputs padded 120 -> 128.
    fw1 = np.zeros((512, 128), np.float32)
    for h in range(4):
        for w in range(4):
            for co in range(16):
                fw1[h * 128 + 32 * w + co, :120] = f1w[:, co * 16 + h * 4 + w]
    fb1 = np.pad(f1b, (0, 8))[None, :]                           # (1, 128)

    fw2 = np.pad(f2w.T, ((0, 8), (0, 44)))                       # (128, 128)
    fb2 = np.pad(f2b, (0, 44))[None, :]                          # (1, 128)
    fw3 = np.pad(f3w.T, ((0, 44), (0, 118)))                     # (128, 128) lane-dense out
    fb3 = np.pad(f3b, (0, 118))[None, :]                         # (1, 128)

    mats = dict(b1w=b1w, b2w=b2w, fw1=fw1, fw2=fw2, fw3=fw3)     # MXU operands -> bf16
    vecs = dict(b1b=b1b, b2b=b2b, fb1=fb1, fb2=fb2, fb3=fb3)     # biases stay f32
    out = {k: jnp.asarray(v, jnp.bfloat16) for k, v in mats.items()}
    out.update({k: jnp.asarray(v, jnp.float32) for k, v in vecs.items()})
    return out


# ----------------------------------------------------------------------------
# Pure-JAX reference mirroring the PyTorch module
# ----------------------------------------------------------------------------
def lenet5_reference(x_nchw, params):
    dn = ("NCHW", "OIHW", "NCHW")
    hp = lax.Precision.HIGHEST
    y = lax.conv_general_dilated(x_nchw, params["conv1_w"], (1, 1), "VALID",
                                 dimension_numbers=dn, precision=hp)
    y = jnp.maximum(y + params["conv1_b"][None, :, None, None], 0.0)
    y = lax.reduce_window(y, -jnp.inf, lax.max, (1, 1, 2, 2), (1, 1, 2, 2), "VALID")
    y = lax.conv_general_dilated(y, params["conv2_w"], (1, 1), "VALID",
                                 dimension_numbers=dn, precision=hp)
    y = jnp.maximum(y + params["conv2_b"][None, :, None, None], 0.0)
    y = lax.reduce_window(y, -jnp.inf, lax.max, (1, 1, 2, 2), (1, 1, 2, 2), "VALID")
    f = y.reshape(y.shape[0], -1)
    f = jnp.maximum(jnp.dot(f, params["fc1_w"].T, precision=hp) + params["fc1_b"], 0.0)
    f = jnp.maximum(jnp.dot(f, params["fc2_w"].T, precision=hp) + params["fc2_b"], 0.0)
    f = jnp.maximum(jnp.dot(f, params["fc3_w"].T, precision=hp) + params["fc3_b"], 0.0)
    return f


def init_params(key):
    ks = jax.random.split(key, 10)
    n = lambda k, s, scale=0.05: (scale * jax.random.normal(k, s)).astype(jnp.float32)
    return {
        "conv1_w": n(ks[0], (6, 1, 5, 5)),   "conv1_b": n(ks[1], (6,)),
        "conv2_w": n(ks[2], (16, 6, 5, 5)),  "conv2_b": n(ks[3], (16,)),
        "fc1_w":   n(ks[4], (120, 256)),     "fc1_b":   n(ks[5], (120,)),
        "fc2_w":   n(ks[6], (84, 120)),      "fc2_b":   n(ks[7], (84,)),
        "fc3_w":   n(ks[8], (10, 84)),       "fc3_b":   n(ks[9], (10,)),
    }


if __name__ == "__main__":
    key = jax.random.PRNGKey(0)
    k_x, k_p = jax.random.split(key)

    params = init_params(k_p)
    kparams = prepare_params(params)          # one-time layout prep, outside forward

    # LeNet5's fc stack (Linear(256, ...)) implies a (B, 1, 28, 28) NCHW input.
    # Small smoke test: batch 2 (single grid step).
    x = jax.random.normal(k_x, (2, 1, 28, 28), dtype=jnp.float32)
    out = jax.block_until_ready(lenet5_forward(x, kparams))
    assert out.shape == (2, 10), out.shape
    ref = lenet5_reference(x, params)
    diff = float(jnp.max(jnp.abs(out - ref)))
    # bf16 MXU operands with f32 accumulation vs. HIGHEST-precision f32 reference.
    assert jnp.allclose(out, ref, atol=2e-2, rtol=2e-2), f"max abs diff {diff}"

    # Multi-step grid test: batch 64 with nb=16 -> 4 pipelined "parallel" steps,
    # weights stay VMEM-resident across steps.
    x2 = jax.random.normal(jax.random.PRNGKey(1), (64, 1, 28, 28), dtype=jnp.float32)
    out2 = jax.block_until_ready(lenet5_forward(x2, kparams, nb=16))
    assert out2.shape == (64, 10), out2.shape
    ref2 = lenet5_reference(x2, params)
    diff2 = float(jnp.max(jnp.abs(out2 - ref2)))
    assert jnp.allclose(out2, ref2, atol=2e-2, rtol=2e-2), f"max abs diff {diff2}"

    print("KERNEL_OK")
</pallas_src>

<mosaic_0001>
module attributes {stable_mosaic.version = 11 : i64} {
  func.func @_lenet5_kernel(%arg0: i32, %arg1: memref<2x28x28xf32, #tpu.memory_space<vmem>>, %arg2: memref<140x144xbf16, #tpu.memory_space<vmem>>, %arg3: memref<1x144xf32, #tpu.memory_space<vmem>>, %arg4: memref<720x128xbf16, #tpu.memory_space<vmem>>, %arg5: memref<1x128xf32, #tpu.memory_space<vmem>>, %arg6: memref<512x128xbf16, #tpu.memory_space<vmem>>, %arg7: memref<1x128xf32, #tpu.memory_space<vmem>>, %arg8: memref<128x128xbf16, #tpu.memory_space<vmem>>, %arg9: memref<1x128xf32, #tpu.memory_space<vmem>>, %arg10: memref<128x128xbf16, #tpu.memory_space<vmem>>, %arg11: memref<1x128xf32, #tpu.memory_space<vmem>>, %arg12: memref<2x128xf32, #tpu.memory_space<vmem>>) attributes {dimension_semantics = [#tpu.dimension_semantics<parallel>], iteration_bounds = array<i64: 1>, scalar_prefetch = 0 : i64, scratch_operands = 0 : i64, tpu.core_type = #tpu.core_type<tc>, window_params = [{transform_indices = @transform_0, window_bounds = array<i64: 2, 28, 28>}, {pipeline_mode = #tpu.pipeline_mode<synchronous>, transform_indices = @transform_1, window_bounds = array<i64: 140, 144>}, {pipeline_mode = #tpu.pipeline_mode<synchronous>, transform_indices = @transform_2, window_bounds = array<i64: 1, 144>}, {pipeline_mode = #tpu.pipeline_mode<synchronous>, transform_indices = @transform_3, window_bounds = array<i64: 720, 128>}, {pipeline_mode = #tpu.pipeline_mode<synchronous>, transform_indices = @transform_4, window_bounds = array<i64: 1, 128>}, {pipeline_mode = #tpu.pipeline_mode<synchronous>, transform_indices = @transform_5, window_bounds = array<i64: 512, 128>}, {pipeline_mode = #tpu.pipeline_mode<synchronous>, transform_indices = @transform_6, window_bounds = array<i64: 1, 128>}, {pipeline_mode = #tpu.pipeline_mode<synchronous>, transform_indices = @transform_7, window_bounds = array<i64: 128, 128>}, {pipeline_mode = #tpu.pipeline_mode<synchronous>, transform_indices = @transform_8, window_bounds = array<i64: 1, 128>}, {pipeline_mode = #tpu.pipeline_mode<synchronous>, transform_indices = @transform_9, window_bounds = array<i64: 128, 128>}, {pipeline_mode = #tpu.pipeline_mode<synchronous>, transform_indices = @transform_10, window_bounds = array<i64: 1, 128>}, {transform_indices = @transform_11, window_bounds = array<i64: 2, 128>}]} {
    %c0 = arith.constant 0 : index
    %c0_0 = arith.constant 0 : index
    %c0_1 = arith.constant 0 : index
    %0 = vector.load %arg1[%c0, %c0_0, %c0_1] : memref<2x28x28xf32, #tpu.memory_space<vmem>>, vector<2x28x28xf32>
    %1 = vector.extract_strided_slice %0 {offsets = [0, 0, 0], sizes = [2, 24, 28], strides = [1, 1, 1]} : vector<2x28x28xf32> to vector<2x24x28xf32>
    %2 = vector.extract_strided_slice %0 {offsets = [0, 1, 0], sizes = [2, 24, 28], strides = [1, 1, 1]} : vector<2x28x28xf32> to vector<2x24x28xf32>
    %3 = vector.extract_strided_slice %0 {offsets = [0, 2, 0], sizes = [2, 24, 28], strides = [1, 1, 1]} : vector<2x28x28xf32> to vector<2x24x28xf32>
    %4 = vector.extract_strided_slice %0 {offsets = [0, 3, 0], sizes = [2, 24, 28], strides = [1, 1, 1]} : vector<2x28x28xf32> to vector<2x24x28xf32>
    %5 = vector.extract_strided_slice %0 {offsets = [0, 4, 0], sizes = [2, 24, 28], strides = [1, 1, 1]} : vector<2x28x28xf32> to vector<2x24x28xf32>
    %6 = tpu.concatenate %1, %2, %3, %4, %5 in 2 : vector<2x24x28xf32>, vector<2x24x28xf32>, vector<2x24x28xf32>, vector<2x24x28xf32>, vector<2x24x28xf32> -> vector<2x24x140xf32>
    %7 = vector.shape_cast %6 : vector<2x24x140xf32> to vector<48x140xf32>
    %8 = arith.truncf %7 : vector<48x140xf32> to vector<48x140xbf16>
    %c0_2 = arith.constant 0 : index
    %c0_3 = arith.constant 0 : index
    %9 = vector.load %arg2[%c0_2, %c0_3] : memref<140x144xbf16, #tpu.memory_space<vmem>>, vector<140x144xbf16>
    %cst = arith.constant dense<0.000000e+00> : vector<48x144xf32>
    %10 = tpu.matmul %8, %9, %cst {dimension_numbers = #tpu.dot_dimension_numbers<[1], [0], [0], [1], [0, 0, 1, 1], [], []>} : vector<48x140xbf16>, vector<140x144xbf16>, vector<48x144xf32> -> vector<48x144xf32>
    %c0_4 = arith.constant 0 : index
    %c0_5 = arith.constant 0 : index
    %11 = vector.load %arg3[%c0_4, %c0_5] : memref<1x144xf32, #tpu.memory_space<vmem>>, vector<1x144xf32>
    %12 = vector.broadcast %11 : vector<1x144xf32> to vector<48x144xf32>
    %13 = arith.addf %10, %12 : vector<48x144xf32>
    %cst_6 = arith.constant 0.000000e+00 : f32
    %14 = vector.broadcast %cst_6 : f32 to vector<48x144xf32>
    %15 = arith.maximumf %13, %14 : vector<48x144xf32>
    %16 = vector.shape_cast %15 : vector<48x144xf32> to vector<2x12x2x144xf32>
    %17 = vector.extract_strided_slice %16 {offsets = [0, 0, 0, 0], sizes = [2, 12, 1, 144], strides = [1, 1, 1, 1]} : vector<2x12x2x144xf32> to vector<2x12x1x144xf32>
    %18 = vector.shape_cast %17 : vector<2x12x1x144xf32> to vector<2x12x144xf32>
    %19 = vector.extract_strided_slice %16 {offsets = [0, 0, 1, 0], sizes = [2, 12, 1, 144], strides = [1, 1, 1, 1]} : vector<2x12x2x144xf32> to vector<2x12x1x144xf32>
    %20 = vector.shape_cast %19 : vector<2x12x1x144xf32> to vector<2x12x144xf32>
    %21 = arith.maximumf %18, %20 : vector<2x12x144xf32>
    %22 = vector.extract_strided_slice %21 {offsets = [0, 0, 6], sizes = [2, 12, 138], strides = [1, 1, 1]} : vector<2x12x144xf32> to vector<2x12x138xf32>
    %23 = vector.extract_strided_slice %21 {offsets = [0, 0, 0], sizes = [2, 12, 6], strides = [1, 1, 1]} : vector<2x12x144xf32> to vector<2x12x6xf32>
    %24 = tpu.concatenate %22, %23 in 2 : vector<2x12x138xf32>, vector<2x12x6xf32> -> vector<2x12x144xf32>
    %25 = arith.maximumf %21, %24 : vector<2x12x144xf32>
    %26 = vector.extract_strided_slice %25 {offsets = [0, 0, 0], sizes = [2, 8, 144], strides = [1, 1, 1]} : vector<2x12x144xf32> to vector<2x8x144xf32>
    %27 = vector.extract_strided_slice %25 {offsets = [0, 1, 0], sizes = [2, 8, 144], strides = [1, 1, 1]} : vector<2x12x144xf32> to vector<2x8x144xf32>
    %28 = vector.extract_strided_slice %25 {offsets = [0, 2, 0], sizes = [2, 8, 144], strides = [1, 1, 1]} : vector<2x12x144xf32> to vector<2x8x144xf32>
    %29 = vector.extract_strided_slice %25 {offsets = [0, 3, 0], sizes = [2, 8, 144], strides = [1, 1, 1]} : vector<2x12x144xf32> to vector<2x8x144xf32>
    %30 = vector.extract_strided_slice %25 {offsets = [0, 4, 0], sizes = [2, 8, 144], strides = [1, 1, 1]} : vector<2x12x144xf32> to vector<2x8x144xf32>
    %31 = tpu.concatenate %26, %27, %28, %29, %30 in 2 : vector<2x8x144xf32>, vector<2x8x144xf32>, vector<2x8x144xf32>, vector<2x8x144xf32>, vector<2x8x144xf32> -> vector<2x8x720xf32>
    %32 = vector.shape_cast %31 : vector<2x8x720xf32> to vector<16x720xf32>
    %33 = arith.truncf %32 : vector<16x720xf32> to vector<16x720xbf16>
    %c0_7 = arith.constant 0 : index
    %c0_8 = arith.constant 0 : index
    %34 = vector.load %arg4[%c0_7, %c0_8] : memref<720x128xbf16, #tpu.memory_space<vmem>>, vector<720x128xbf16>
    %cst_9 = arith.constant dense<0.000000e+00> : vector<16x128xf32>
    %35 = tpu.matmul %33, %34, %cst_9 {dimension_numbers = #tpu.dot_dimension_numbers<[1], [0], [0], [1], [0, 0, 1, 1], [], []>} : vector<16x720xbf16>, vector<720x128xbf16>, vector<16x128xf32> -> vector<16x128xf32>
    %c0_10 = arith.constant 0 : index
    %c0_11 = arith.constant 0 : index
    %36 = vector.load %arg5[%c0_10, %c0_11] : memref<1x128xf32, #tpu.memory_space<vmem>>, vector<1x128xf32>
    %37 = vector.broadcast %36 : vector<1x128xf32> to vector<16x128xf32>
    %38 = arith.addf %35, %37 : vector<16x128xf32>
    %cst_12 = arith.constant 0.000000e+00 : f32
    %39 = vector.broadcast %cst_12 : f32 to vector<16x128xf32>
    %40 = arith.maximumf %38, %39 : vector<16x128xf32>
    %41 = vector.shape_cast %40 : vector<16x128xf32> to vector<2x4x2x128xf32>
    %42 = vector.extract_strided_slice %41 {offsets = [0, 0, 0, 0], sizes = [2, 4, 1, 128], strides = [1, 1, 1, 1]} : vector<2x4x2x128xf32> to vector<2x4x1x128xf32>
    %43 = vector.shape_cast %42 : vector<2x4x1x128xf32> to vector<2x4x128xf32>
    %44 = vector.extract_strided_slice %41 {offsets = [0, 0, 1, 0], sizes = [2, 4, 1, 128], strides = [1, 1, 1, 1]} : vector<2x4x2x128xf32> to vector<2x4x1x128xf32>
    %45 = vector.shape_cast %44 : vector<2x4x1x128xf32> to vector<2x4x128xf32>
    %46 = arith.maximumf %43, %45 : vector<2x4x128xf32>
    %47 = vector.extract_strided_slice %46 {offsets = [0, 0, 16], sizes = [2, 4, 112], strides = [1, 1, 1]} : vector<2x4x128xf32> to vector<2x4x112xf32>
    %48 = vector.extract_strided_slice %46 {offsets = [0, 0, 0], sizes = [2, 4, 16], strides = [1, 1, 1]} : vector<2x4x128xf32> to vector<2x4x16xf32>
    %49 = tpu.concatenate %47, %48 in 2 : vector<2x4x112xf32>, vector<2x4x16xf32> -> vector<2x4x128xf32>
    %50 = arith.maximumf %46, %49 : vector<2x4x128xf32>
    %51 = vector.extract_strided_slice %50 {offsets = [0, 0, 0], sizes = [2, 1, 128], strides = [1, 1, 1]} : vector<2x4x128xf32> to vector<2x1x128xf32>
    %52 = vector.shape_cast %51 : vector<2x1x128xf32> to vector<2x128xf32>
    %53 = vector.extract_strided_slice %50 {offsets = [0, 1, 0], sizes = [2, 1, 128], strides = [1, 1, 1]} : vector<2x4x128xf32> to vector<2x1x128xf32>
    %54 = vector.shape_cast %53 : vector<2x1x128xf32> to vector<2x128xf32>
    %55 = vector.extract_strided_slice %50 {offsets = [0, 2, 0], sizes = [2, 1, 128], strides = [1, 1, 1]} : vector<2x4x128xf32> to vector<2x1x128xf32>
    %56 = vector.shape_cast %55 : vector<2x1x128xf32> to vector<2x128xf32>
    %57 = vector.extract_strided_slice %50 {offsets = [0, 3, 0], sizes = [2, 1, 128], strides = [1, 1, 1]} : vector<2x4x128xf32> to vector<2x1x128xf32>
    %58 = vector.shape_cast %57 : vector<2x1x128xf32> to vector<2x128xf32>
    %59 = tpu.concatenate %52, %54, %56, %58 in 1 : vector<2x128xf32>, vector<2x128xf32>, vector<2x128xf32>, vector<2x128xf32> -> vector<2x512xf32>
    %60 = arith.truncf %59 : vector<2x512xf32> to vector<2x512xbf16>
    %c0_13 = arith.constant 0 : index
    %c0_14 = arith.constant 0 : index
    %61 = vector.load %arg6[%c0_13, %c0_14] : memref<512x128xbf16, #tpu.memory_space<vmem>>, vector<512x128xbf16>
    %cst_15 = arith.constant dense<0.000000e+00> : vector<2x128xf32>
    %62 = tpu.matmul %60, %61, %cst_15 {dimension_numbers = #tpu.dot_dimension_numbers<[1], [0], [0], [1], [0, 0, 1, 1], [], []>} : vector<2x512xbf16>, vector<512x128xbf16>, vector<2x128xf32> -> vector<2x128xf32>
    %c0_16 = arith.constant 0 : index
    %c0_17 = arith.constant 0 : index
    %63 = vector.load %arg7[%c0_16, %c0_17] : memref<1x128xf32, #tpu.memory_space<vmem>>, vector<1x128xf32>
    %64 = vector.broadcast %63 : vector<1x128xf32> to vector<2x128xf32>
    %65 = arith.addf %62, %64 : vector<2x128xf32>
    %cst_18 = arith.constant 0.000000e+00 : f32
    %66 = vector.broadcast %cst_18 : f32 to vector<2x128xf32>
    %67 = arith.maximumf %65, %66 : vector<2x128xf32>
    %68 = arith.truncf %67 : vector<2x128xf32> to vector<2x128xbf16>
    %c0_19 = arith.constant 0 : index
    %c0_20 = arith.constant 0 : index
    %69 = vector.load %arg8[%c0_19, %c0_20] : memref<128x128xbf16, #tpu.memory_space<vmem>>, vector<128x128xbf16>
    %cst_21 = arith.constant dense<0.000000e+00> : vector<2x128xf32>
    %70 = tpu.matmul %68, %69, %cst_21 {dimension_numbers = #tpu.dot_dimension_numbers<[1], [0], [0], [1], [0, 0, 1, 1], [], []>} : vector<2x128xbf16>, vector<128x128xbf16>, vector<2x128xf32> -> vector<2x128xf32>
    %c0_22 = arith.constant 0 : index
    %c0_23 = arith.constant 0 : index
    %71 = vector.load %arg9[%c0_22, %c0_23] : memref<1x128xf32, #tpu.memory_space<vmem>>, vector<1x128xf32>
    %72 = vector.broadcast %71 : vector<1x128xf32> to vector<2x128xf32>
    %73 = arith.addf %70, %72 : vector<2x128xf32>
    %cst_24 = arith.constant 0.000000e+00 : f32
    %74 = vector.broadcast %cst_24 : f32 to vector<2x128xf32>
    %75 = arith.maximumf %73, %74 : vector<2x128xf32>
    %76 = arith.truncf %75 : vector<2x128xf32> to vector<2x128xbf16>
    %c0_25 = arith.constant 0 : index
    %c0_26 = arith.constant 0 : index
    %77 = vector.load %arg10[%c0_25, %c0_26] : memref<128x128xbf16, #tpu.memory_space<vmem>>, vector<128x128xbf16>
    %cst_27 = arith.constant dense<0.000000e+00> : vector<2x128xf32>
    %78 = tpu.matmul %76, %77, %cst_27 {dimension_numbers = #tpu.dot_dimension_numbers<[1], [0], [0], [1], [0, 0, 1, 1], [], []>} : vector<2x128xbf16>, vector<128x128xbf16>, vector<2x128xf32> -> vector<2x128xf32>
    %c0_28 = arith.constant 0 : index
    %c0_29 = arith.constant 0 : index
    %79 = vector.load %arg11[%c0_28, %c0_29] : memref<1x128xf32, #tpu.memory_space<vmem>>, vector<1x128xf32>
    %80 = vector.broadcast %79 : vector<1x128xf32> to vector<2x128xf32>
    %81 = arith.addf %78, %80 : vector<2x128xf32>
    %cst_30 = arith.constant 0.000000e+00 : f32
    %82 = vector.broadcast %cst_30 : f32 to vector<2x128xf32>
    %83 = arith.maximumf %81, %82 : vector<2x128xf32>
    %c0_31 = arith.constant 0 : index
    %c0_32 = arith.constant 0 : index
    %84 = vector.load %arg12[%c0_31, %c0_32] : memref<2x128xf32, #tpu.memory_space<vmem>>, vector<2x128xf32>
    tpu.vector_store %arg12[%c0_31, %c0_32], %83 {strides = array<i32>} : memref<2x128xf32, #tpu.memory_space<vmem>>, vector<2x128xf32>,
    return
  }
  func.func @transform_0(%arg0: i32) -> (i32, i32, i32) {
    %c0_i32 = arith.constant 0 : i32
    %c0_i32_0 = arith.constant 0 : i32
    %c0_i32_1 = arith.constant 0 : i32
    return %arg0, %c0_i32, %c0_i32_0 : i32, i32, i32
  }
  func.func @transform_1(%arg0: i32) -> (i32, i32) {
    %c0_i32 = arith.constant 0 : i32
    %c0_i32_0 = arith.constant 0 : i32
    %c0_i32_1 = arith.constant 0 : i32
    return %c0_i32, %c0_i32_0 : i32, i32
  }
  func.func @transform_2(%arg0: i32) -> (i32, i32) {
    %c0_i32 = arith.constant 0 : i32
    %c0_i32_0 = arith.constant 0 : i32
    %c0_i32_1 = arith.constant 0 : i32
    return %c0_i32, %c0_i32_0 : i32, i32
  }
  func.func @transform_3(%arg0: i32) -> (i32, i32) {
    %c0_i32 = arith.constant 0 : i32
    %c0_i32_0 = arith.constant 0 : i32
    %c0_i32_1 = arith.constant 0 : i32
    return %c0_i32, %c0_i32_0 : i32, i32
  }
  func.func @transform_4(%arg0: i32) -> (i32, i32) {
    %c0_i32 = arith.constant 0 : i32
    %c0_i32_0 = arith.constant 0 : i32
    %c0_i32_1 = arith.constant 0 : i32
    return %c0_i32, %c0_i32_0 : i32, i32
  }
  func.func @transform_5(%arg0: i32) -> (i32, i32) {
    %c0_i32 = arith.constant 0 : i32
    %c0_i32_0 = arith.constant 0 : i32
    %c0_i32_1 = arith.constant 0 : i32
    return %c0_i32, %c0_i32_0 : i32, i32
  }
  func.func @transform_6(%arg0: i32) -> (i32, i32) {
    %c0_i32 = arith.constant 0 : i32
    %c0_i32_0 = arith.constant 0 : i32
    %c0_i32_1 = arith.constant 0 : i32
    return %c0_i32, %c0_i32_0 : i32, i32
  }
  func.func @transform_7(%arg0: i32) -> (i32, i32) {
    %c0_i32 = arith.constant 0 : i32
    %c0_i32_0 = arith.constant 0 : i32
    %c0_i32_1 = arith.constant 0 : i32
    return %c0_i32, %c0_i32_0 : i32, i32
  }
  func.func @transform_8(%arg0: i32) -> (i32, i32) {
    %c0_i32 = arith.constant 0 : i32
    %c0_i32_0 = arith.constant 0 : i32
    %c0_i32_1 = arith.constant 0 : i32
    return %c0_i32, %c0_i32_0 : i32, i32
  }
  func.func @transform_9(%arg0: i32) -> (i32, i32) {
    %c0_i32 = arith.constant 0 : i32
    %c0_i32_0 = arith.constant 0 : i32
    %c0_i32_1 = arith.constant 0 : i32
    return %c0_i32, %c0_i32_0 : i32, i32
  }
  func.func @transform_10(%arg0: i32) -> (i32, i32) {
    %c0_i32 = arith.constant 0 : i32
    %c0_i32_0 = arith.constant 0 : i32
    %c0_i32_1 = arith.constant 0 : i32
    return %c0_i32, %c0_i32_0 : i32, i32
  }
  func.func @transform_11(%arg0: i32) -> (i32, i32) {
    %c0_i32 = arith.constant 0 : i32
    %c0_i32_0 = arith.constant 0 : i32
    return %arg0, %c0_i32 : i32, i32
  }
}

</mosaic_0001>

<bundles_post_ra>
// kernel: lenet5_forward.1
= control target key start
LH: loop header
LB: loop body
LE: loop exit
PB: predicated region body
PF: predicated region fallthrough
CT: control target
= control target key end

     0   :  { %16 = vsyncpa [#allocation3], 0  ;;  %s4813_s0 = inlined_call_operand.vmem [shape: f32[2,28,28], index: 0, kind: input, shape index: {}]   ;;  %s4814_s1 = inlined_call_operand.hbm [shape: bf16[140,144], index: 1, kind: input, shape index: {}]   ;;  %s4815_s2 = inlined_call_operand.vmem [shape: f32[1,144], index: 2, kind: input, shape index: {}]   ;;  %s4816_s3 = inlined_call_operand.hbm [shape: bf16[720,128], index: 3, kind: input, shape index: {}]   ;;  %s4817_s4 = inlined_call_operand.vmem [shape: f32[1,128], index: 4, kind: input, shape index: {}]   ;;  %s4818_s5 = inlined_call_operand.vmem [shape: bf16[512,128], index: 5, kind: input, shape index: {}]   ;;  %s4819_s6 = inlined_call_operand.vmem [shape: f32[1,128], index: 6, kind: input, shape index: {}]   ;;  %s4820_s7 = inlined_call_operand.hbm [shape: bf16[128,128], index: 7, kind: input, shape index: {}]   ;;  %s4821_s8 = inlined_call_operand.vmem [shape: f32[1,128], index: 8, kind: input, shape index: {}]   ;;  %s4822_s9 = inlined_call_operand.hbm [shape: bf16[128,128], index: 9, kind: input, shape index: {}]   ;;  %s4823_s10 = inlined_call_operand.vmem [shape: f32[1,128], index: 10, kind: input, shape index: {}]   ;;  %s4824_s11 = inlined_call_operand.hbm [shape: f32[2,128], index: 11, kind: output, shape index: {}]  }
   0x1   :  { %17 = vsyncpa [#allocation6], 0 }
   0x2   :  { %18 = vsyncpa [#allocation9], 0 }
   0x3   :  { %19 = vsyncpa [#allocation4], 0  ;;  %s3543_s17 = smov [#allocation5]   ;;  %s3425_s21 = scalar_lea.hbm %s4816_s3, 5760 }
   0x4   :  { %s41_s18 = sshll.u32 %s3543_s17, 4  ;;  %p3426_p0 = scmp.ne.s32.totalorder %s4816_s3, %s3425_s21  ;;  %s42_s18 = int_to_ptr.vmem [resolvable:$true] %s41_s18 }
   0x5   :  { %p3429_p1 = scmp.lt.u32.totalorder %s3425_s21, %s4816_s3 }
   0x7   :  { %p3431_p2 = pnand %p3429_p1, %p3426_p0 }
   0x9   :  { %3434 = shalt.err (!%p3431_p2)
}
   0xa   :  { %s3435_s26 = scalar_lea.vmem %s42_s18, 5760  ;;  %p3440_p4 = scmp.lt.s32.totalorder %s42_s18, %s42_s18 }
   0xb   :  { %p3436_p3 = scmp.ne.s32.totalorder %s42_s18, %s3435_s26  ;;  %p3441_p5 = scmp.lt.s32.totalorder %s3435_s26, %s3435_s26 }
   0xd   :  { %p3442_p6 = por %p3441_p5, %p3440_p4 }
   0xf   :  { %p3443_p7 = pnand %p3442_p6, %p3436_p3 }
  0x11   :  { %3446 = shalt.err (!%p3443_p7)
}
  0x12   :  { %s3544_s27 = smov 64   ;;  %s3545_s28 = smov 4  }
  0x13   :  { %47 = dma.hbm_to_vmem [thread:$0]  %s4816_s3, 5760, %s42_s18, [#allocation6], %s3544_s27, %s3544_s27, %s3545_s28  }
  0x14   :  { %s3546_s12 = smov [#allocation2]   ;;  %s3447_s16 = scalar_lea.hbm %s4814_s1, 2304 }
  0x15   :  { %s27_s13 = sshll.u32 %s3546_s12, 4  ;;  %p3448_p8 = scmp.ne.s32.totalorder %s4814_s1, %s3447_s16  ;;  %s28_s13 = int_to_ptr.vmem [resolvable:$true] %s27_s13 }
  0x16   :  { %p3451_p9 = scmp.lt.u32.totalorder %s3447_s16, %s4814_s1 }
  0x18   :  { %p3453_p10 = pnand %p3451_p9, %p3448_p8 }
  0x1a   :  { %3456 = shalt.err (!%p3453_p10)
}
  0x1b   :  { %s3457_s22 = scalar_lea.vmem %s28_s13, 2304  ;;  %p3462_p12 = scmp.lt.s32.totalorder %s28_s13, %s28_s13 }
  0x1c   :  { %p3458_p11 = scmp.ne.s32.totalorder %s28_s13, %s3457_s22  ;;  %p3463_p13 = scmp.lt.s32.totalorder %s3457_s22, %s3457_s22 }
  0x1e   :  { %p3464_p0 = por %p3463_p13, %p3462_p12 }
  0x20   :  { %p3465_p1 = pnand %p3464_p0, %p3458_p11 }
  0x22   :  { %3468 = shalt.err (!%p3465_p1)
}
  0x23   :  { %s3547_s3 = smov 128   ;;  %s3548_s18 = smov 8  }
  0x24   :  { %33 = dma.hbm_to_vmem [thread:$0]  %s4814_s1, 2304, %s28_s13, [#allocation3], %s3547_s3, %s3547_s3, %s3548_s18  }
  0x25   :  { %s3549_s25 = smov [#allocation7]   ;;  %s3550_s29 = smov [#allocation8]  }
  0x26   :  { %s59_s26 = sshll.u32 %s3549_s25, 4  ;;  %s73_s30 = sshll.u32 %s3550_s29, 4  ;;  %s60_s26 = int_to_ptr.vmem [resolvable:$true] %s59_s26  ;;  %s3652_s30 = int_to_ptr.vmem [resolvable:$true] %s73_s30 }
  0x27   :  { %s3469_s15 = scalar_lea.hbm %s4820_s7, 1024 }
  0x28   :  { %p3470_p2 = scmp.ne.s32.totalorder %s4820_s7, %s3469_s15  ;;  %p3473_p3 = scmp.lt.u32.totalorder %s3469_s15, %s4820_s7 }
  0x2a   :  { %p3475_p4 = pnand %p3473_p3, %p3470_p2 }
  0x2c   :  { %3478 = shalt.err (!%p3475_p4)
}
  0x2d   :  { %s3479_s1 = scalar_lea.vmem %s60_s26, 1024  ;;  %p3484_p6 = scmp.lt.s32.totalorder %s60_s26, %s60_s26 }
  0x2e   :  { %p3480_p5 = scmp.ne.s32.totalorder %s60_s26, %s3479_s1  ;;  %p3485_p7 = scmp.lt.s32.totalorder %s3479_s1, %s3479_s1 }
  0x30   :  { %p3486_p8 = por %p3485_p7, %p3484_p6 }
  0x32   :  { %p3487_p9 = pnand %p3486_p8, %p3480_p5 }
  0x34   :  { %3490 = shalt.err (!%p3487_p9)
}
  0x35   :  { %65 = dma.hbm_to_vmem [thread:$0]  %s4820_s7, 1024, %s60_s26, [#allocation6], %s3544_s27, %s3544_s27, %s3545_s28  }
  0x36   :  { %s3491_s18 = scalar_lea.hbm %s4822_s9, 1024 }
  0x37   :  { %p3492_p10 = scmp.ne.s32.totalorder %s4822_s9, %s3491_s18  ;;  %p3495_p11 = scmp.lt.u32.totalorder %s3491_s18, %s4822_s9 }
  0x39   :  { %p3497_p12 = pnand %p3495_p11, %p3492_p10 }
  0x3b   :  { %3500 = shalt.err (!%p3497_p12)
}
  0x3c   :  { %s3501_s12 = scalar_lea.vmem %s3652_s30, 1024  ;;  %p3506_p0 = scmp.lt.s32.totalorder %s3652_s30, %s3652_s30 }
  0x3d   :  { %p3502_p13 = scmp.ne.s32.totalorder %s3652_s30, %s3501_s12  ;;  %p3507_p1 = scmp.lt.s32.totalorder %s3501_s12, %s3501_s12 }
  0x3f   :  { %p3508_p2 = por %p3507_p1, %p3506_p0 }
  0x41   :  { %p3509_p3 = pnand %p3508_p2, %p3502_p13 }
  0x43   :  { %3512 = shalt.err (!%p3509_p3)
}
  0x44   :  { %79 = dma.hbm_to_vmem [thread:$0]  %s4822_s9, 1024, %s3652_s30, [#allocation9], %s3544_s27, %s3544_s27, %s3545_s28  }
  0x45   :  { %3535 = dma.done.wait [#allocation3], 2304  }
  0x46   :  { %3536 = vsyncadd [#allocation3], 4294964992 }
  0x47   :  { %3537 = dma.done.wait [#allocation6], 6784  }
  0x48   :  { %3538 = vsyncadd [#allocation6], 4294960512 }
  0x49   :  { %3539 = dma.done.wait [#allocation9], 1024  }
  0x4a   :  { %3540 = vsyncadd [#allocation9], 4294966272  ;;  %vm111_vm0 = vcmask 1046528   ;;  %v3692_v0 = vld [vmem:[%s4813_s0] sm:$0xff]  ;;  %v3697_v1 = vld [vmem:[%s4813_s0 + $0x8] sm:$0xff]  ;;  %vm177_vm1 = vcmask 1044480  }
  0x4b   :  { %v3702_v2 = vld [vmem:[%s4813_s0 + $0x10] sm:$0xff]  ;;  %vm144_vm2 = vcmask 1045504   ;;  %vm210_vm3 = vcmask 1043456   ;;  %v112_v3 = vrot.slane %v3692_v0, 1  ;;  %v113_v4 = vrot.slane %v3697_v1, 1  ;;  %v3722_v16 = vld [vmem:[%s4813_s0 + $0x20] sm:$0xff] }
  0x4c   :  { %v115_v5 = vrot.slane %v3702_v2, 1  ;;  %v178_v6 = vrot.slane %v3692_v0, 3  ;;  %v179_v7 = vrot.slane %v3697_v1, 3  ;;  %v181_v8 = vrot.slane %v3702_v2, 3  ;;  %v98_v11 = vld [vmem:[%s4813_s0 + $0x18] sm:$0xf] }
  0x4d   :  { %v145_v9 = vrot.slane %v3692_v0, 2  ;;  %v146_v10 = vrot.slane %v3697_v1, 2  ;;  %v114_v12 = vsel %vm111_vm0, %v112_v3, %v113_v4  ;;  %v148_v14 = vrot.slane %v3702_v2, 2  ;;  %v3727_v17 = vld [vmem:[%s4813_s0 + $0x28] sm:$0xff]  ;;  %v3308_v28 = vld [vmem:[#allocation2 + $0x14] ss:$8 sps:$4 sm:$0xff]  }
  0x4e   :  { %v116_v13 = vsel %vm111_vm0, %v113_v4, %v115_v5  ;;  %v211_v15 = vrot.slane %v3692_v0, 4  ;;  %v180_v19 = vsel %vm177_vm1, %v178_v6, %v179_v7  ;;  %v182_v20 = vsel %vm177_vm1, %v179_v7, %v181_v8  ;;  %v3305_v22 = vld [vmem:[#allocation2 + $0x4] ss:$8 sps:$4 sm:$0xff]   ;;  %v3307_v23 = vld [vmem:[#allocation2] ss:$8 sps:$4 sm:$0xff]   ;;  %s3551_s22 = smov 28  }
  0x4f   :  { %v3205_v18 = vpack.i.bf16 %v116_v13, %v114_v12  ;;  %v147_v21 = vsel %vm144_vm2, %v145_v9, %v146_v10  ;;  %v3215_v24 = vpack.i.bf16 %v182_v20, %v180_v19  ;;  %v149_v25 = vsel %vm144_vm2, %v146_v10, %v148_v14  ;;  %411 = vmatprep.subr.bf16.mxu0 %v3305_v22  ;;  %s3552_s3 = smov 84   ;;  %v3310_v37 = vld [vmem:[#allocation2 + $0x10] ss:$8 sps:$4 sm:$0xff]   ;;  %v3311_v43 = vld [vmem:[#allocation2 + $0x24] ss:$8 sps:$4 sm:$0xff]   ;;  %s3553_s29 = smov 56  }
  0x50   :  { %v212_v26 = vrot.slane %v3697_v1, 4  ;;  %v214_v27 = vrot.slane %v3702_v2, 4  ;;  %v3210_v29 = vpack.i.bf16 %v149_v25, %v147_v21  ;;  %v117_v30 = vrot.slane %v98_v11, 1  ;;  %412 = vmatpush1.bf16.msra.mxu0 %v3307_v23  ;;  %v3748_v42 = vld [vmem:[%s4813_s0 + $0x30] sm:$0xff]  ;;  %v102_v48 = vld [vmem:[%s4813_s0 + $0x38] sm:$0xf] }
  0x51   :  { %3206 = vrot.lane.b32.xlu0 %v3205_v18, %s3551_s22  ;;  %v119_v31 = vrot.slane %v3722_v16, 1  ;;  %v120_v32 = vrot.slane %v3727_v17, 1  ;;  %3216 = vrot.lane.b32.xlu1 %v3215_v24, %s3552_s3  ;;  %v150_v35 = vrot.slane %v98_v11, 2  ;;  %v152_v36 = vrot.slane %v3722_v16, 2  ;;  %s3554_s12 = smov 112   ;;  %s3557_s26 = smov 10  }
  0x52   :  { %v213_v33 = vsel %vm210_vm3, %v211_v15, %v212_v26  ;;  %v215_v34 = vsel %vm210_vm3, %v212_v26, %v214_v27  ;;  %v118_v39 = vsel %vm111_vm0, %v115_v5, %v117_v30  ;;  %v153_v41 = vrot.slane %v3727_v17, 2  ;;  %413 = vmatprep.subr.bf16.mxu0 %v3308_v28  ;;  %v3313_v57 = vld [vmem:[#allocation2 + $0x20] ss:$8 sps:$4 sm:$0xff]   ;;  %v3314_v62 = vld [vmem:[#allocation2 + $0x34] ss:$8 sps:$4 sm:$0xff]   ;;  %s3559_s14 = smov 32  }
  0x53   :  { %v3220_v38 = vpack.i.bf16 %v215_v34, %v213_v33  ;;  %v121_v40 = vsel %vm111_vm0, %v119_v31, %v120_v32  ;;  %v151_v45 = vsel %vm144_vm2, %v148_v14, %v150_v35  ;;  %v183_v46 = vrot.slane %v98_v11, 3  ;;  %v3316_v10 = vld [vmem:[#allocation2 + $0x30] ss:$8 sps:$4 sm:$0xff]   ;;  %v3317_v15 = vld [vmem:[#allocation2 + $0x44] ss:$8 sps:$4 sm:$0xff]   ;;  %s3560_s15 = smov 16  }
  0x54   :  { %v3225_v44 = vpack.i.bf16 %v121_v40, %v118_v39  ;;  %v185_v47 = vrot.slane %v3722_v16, 3  ;;  %v154_v49 = vsel %vm144_vm2, %v152_v36, %v153_v41  ;;  %v186_v50 = vrot.slane %v3727_v17, 3  ;;  %414 = vmatpush1.bf16.msra.mxu0 %v3310_v37  ;;  %v3331_v19 = vld [vmem:[#allocation2 + $0x80] ss:$8 sps:$4 sm:$0x3f]   ;;  %s3561_s16 = smov 48  }
  0x55   :  { %3211 = vrot.lane.b32.xlu0 %v3210_v29, %s3553_s29  ;;  %v216_v51 = vrot.slane %v98_v11, 4  ;;  %v218_v52 = vrot.slane %v3722_v16, 4  ;;  %3221 = vrot.lane.b32.xlu1 %v3220_v38, %s3554_s12  ;;  %v3230_v53 = vpack.i.bf16 %v154_v49, %v151_v45  ;;  %v184_v54 = vsel %vm177_vm1, %v181_v8, %v183_v46  ;;  %v3319_v23 = vld [vmem:[#allocation2 + $0x40] ss:$8 sps:$4 sm:$0xff]   ;;  %v3320_v26 = vld [vmem:[#allocation2 + $0x54] ss:$8 sps:$4 sm:$0xff]  }
  0x56   :  { %v219_v55 = vrot.slane %v3727_v17, 4  ;;  %v122_v56 = vrot.slane %v3748_v42, 1  ;;  %v187_v58 = vsel %vm177_vm1, %v185_v47, %v186_v50  ;;  %v124_v60 = vrot.slane %v102_v48, 1  ;;  %415 = vmatprep.subr.bf16.mxu0 %v3311_v43  ;;  %v3323_v29 = vld [vmem:[#allocation2 + $0x64] ss:$8 sps:$4 sm:$0xff]  }
  0x57   :  { %v217_v59 = vsel %vm210_vm3, %v214_v27, %v216_v51  ;;  %v155_v61 = vrot.slane %v3748_v42, 2  ;;  %v157_v3 = vrot.slane %v102_v48, 2  ;;  %v3235_v4 = vpack.i.bf16 %v187_v58, %v184_v54  ;;  %v3322_v27 = vld [vmem:[#allocation2 + $0x50] ss:$8 sps:$4 sm:$0xff]   ;;  %v3326_v33 = vld [vmem:[#allocation2 + $0x74] ss:$8 sps:$4 sm:$0xff]  }
  0x58   :  { %v220_v63 = vsel %vm210_vm3, %v218_v52, %v219_v55  ;;  %v123_v5 = vsel %vm111_vm0, %v120_v32, %v122_v56  ;;  %v125_v7 = vsel %vm111_vm0, %v122_v56, %v124_v60  ;;  %v188_v8 = vrot.slane %v3748_v42, 3  ;;  %416 = vmatpush1.bf16.msra.mxu0 %v3313_v57  ;;  %v3325_v32 = vld [vmem:[#allocation2 + $0x60] ss:$8 sps:$4 sm:$0xff]   ;;  %v3328_v34 = vld [vmem:[#allocation2 + $0x70] ss:$8 sps:$4 sm:$0xff]  }
  0x59   :  { %3226 = vrot.lane.b32.xlu0 %v3225_v44, %s3551_s22  ;;  %3231 = vrot.lane.b32.xlu1 %v3230_v53, %s3553_s29  ;;  %v3240_v6 = vpack.i.bf16 %v220_v63, %v217_v59  ;;  %v190_v9 = vrot.slane %v102_v48, 3  ;;  %v156_v11 = vsel %vm144_vm2, %v153_v41, %v155_v61  ;;  %v158_v12 = vsel %vm144_vm2, %v155_v61, %v157_v3  ;;  %v3329_v35 = vld [vmem:[#allocation2 + $0x84] ss:$8 sps:$4 sm:$0x3f]  }
  0x5a   :  { %v221_v13 = vrot.slane %v3748_v42, 4  ;;  %v223_v14 = vrot.slane %v102_v48, 4  ;;  %417 = vmatprep.subr.bf16.mxu0 %v3314_v62  ;;  %v3245_v18 = vpack.i.bf16 %v125_v7, %v123_v5  ;;  %v3250_v20 = vpack.i.bf16 %v158_v12, %v156_v11 }
  0x5b   :  { %v189_v21 = vsel %vm177_vm1, %v186_v50, %v188_v8  ;;  %v191_v22 = vsel %vm177_vm1, %v188_v8, %v190_v9  ;;  %v406_v31 = vsel %vm144_vm2, %v3331_v19, 0  ;;  %vm243_vm4 = vcmask 228352  }
  0x5c   :  { %418 = vmatpush1.bf16.msra.mxu0 %v3316_v10  ;;  %v222_v24 = vsel %vm210_vm3, %v219_v55, %v221_v13  ;;  %v224_v25 = vsel %vm210_vm3, %v221_v13, %v223_v14  ;;  %v3255_v28 = vpack.i.bf16 %v191_v22, %v189_v21  ;;  %vm250_vm5 = vcmask 457728  }
  0x5d   :  { %3236 = vrot.lane.b32.xlu0 %v3235_v4, %s3552_s3  ;;  %3241 = vrot.lane.b32.xlu1 %v3240_v6, %s3554_s12  ;;  %v3260_v30 = vpack.i.bf16 %v224_v25, %v222_v24  ;;  %vm257_vm6 = vcmask 687104   ;;  %vm264_vm7 = vcmask 916480   ;;  %vm395_vm8 = vcmask 97280  }
  0x5e   :  { %419 = vmatprep.subr.bf16.mxu0 %v3317_v15  ;;  %vm942_vm9 = vcmask 1041409   ;;  %vm944_vm10 = vcmask 1042434   ;;  %vm946_vm11 = vcmask 1043459   ;;  %vm948_vm12 = vcmask 1044484  }
  0x5f   :  { %vm950_vm13 = vcmask 1045509   ;;  %vm952_vm14 = vcmask 1046534   ;;  %vm954_vm15 = vcmask 1047559   ;;  %vm1005_vm0 = vcmask 998400  }
  0x60   :  { %420 = vmatpush1.bf16.msra.mxu0 %v3319_v23  ;;  %vm1026_vm1 = vcmask 80896   ;;  %vm1440_vm3 = vcmask 261120  }
  0x61   :  { %3246 = vrot.lane.b32.xlu0 %v3245_v18, %s3551_s22  ;;  %3251 = vrot.lane.b32.xlu1 %v3250_v20, %s3553_s29 }
  0x62   :  { %421 = vmatprep.subr.bf16.mxu0 %v3320_v26 }
  0x64   :  { %422 = vmatpush1.bf16.msra.mxu0 %v3322_v27 }
  0x65   :  { %3256 = vrot.lane.b32.xlu0 %v3255_v28, %s3552_s3  ;;  %3261 = vrot.lane.b32.xlu1 %v3260_v30, %s3554_s12 }
  0x66   :  { %423 = vmatprep.subr.bf16.mxu0 %v3323_v29 }
  0x68   :  { %424 = vmatpush1.bf16.msra.mxu0 %v3325_v32 }
  0x69   :  { %425 = vmatprep.subr.bf16.mxu0 %v3326_v33 }
  0x6c   :  { %426 = vmatpush1.bf16.msra.mxu0 %v3328_v34 }
  0x6d   :  { %2903 = vmatprep.subr.msk.bf16.mxu0 %vm144_vm2, %v3329_v35  ;;  %vm1379_vm2 = vcmask 130048  }
  0x70   :  { %428 = vmatpush1.bf16.msra.mxu0 %v406_v31 }
  0xc3   :  { %v3207_v36 = vpop.permute.xlu0 %3206  ;;  %v3217_v37 = vpop.permute.xlu1 %3216 }
  0xc4   :  { %v3209_v38 = vunpack.i.h.bf16 %v3207_v36  ;;  %v3208_v39 = vunpack.i.l.bf16 %v3207_v36  ;;  %v3219_v41 = vunpack.i.h.bf16 %v3217_v37  ;;  %v3218_v43 = vunpack.i.l.bf16 %v3217_v37 }
  0xc6   :  { %v245_v47 = vsel %vm243_vm4, %v3697_v1, %v3209_v38  ;;  %v244_v48 = vsel %vm243_vm4, %v3692_v0, %v3208_v39  ;;  %v297_v38 = vlaneseq }
  0xc7   :  { %v3212_v40 = vpop.permute.xlu0 %3211  ;;  %v3222_v46 = vpop.permute.xlu1 %3221 }
  0xc8   :  { %v3214_v44 = vunpack.i.h.bf16 %v3212_v40  ;;  %v3213_v45 = vunpack.i.l.bf16 %v3212_v40  ;;  %v3224_v49 = vunpack.i.h.bf16 %v3222_v46  ;;  %v3223_v50 = vunpack.i.l.bf16 %v3222_v46 }
  0xc9   :  { %v298_v39 = vshrl.u32 %v297_v38, 7 }
  0xca   :  { %v251_v51 = vsel %vm250_vm5, %v244_v48, %v3213_v45  ;;  %v252_v52 = vsel %vm250_vm5, %v245_v47, %v3214_v44  ;;  %v272_v54 = vpack.c.bf16 %v3224_v49, %v3223_v50  ;;  %v3555_v44 = vmov 1983009808  }
  0xcb   :  { %v3227_v53 = vpop.permute.xlu0 %3226  ;;  %v258_v55 = vsel %vm257_vm6, %v251_v51, %v3218_v43  ;;  %v259_v56 = vsel %vm257_vm6, %v252_v52, %v3219_v41  ;;  %v3232_v59 = vpop.permute.xlu1 %3231  ;;  %v3820_v40 = vsub.s32 0, %v298_v39  ;;  %v295_v41 = vld [vmem:[%s4815_s2] sm:$0x3]  ;;  %v303_v43 = vsub.s32 1, %v298_v39  ;;  %s3556_s2 = smov 122  }
  0xcc   :  { %v3229_v57 = vunpack.i.h.bf16 %v3227_v53  ;;  %v3228_v58 = vunpack.i.l.bf16 %v3227_v53  ;;  %v265_v1 = vsel %vm264_vm7, %v258_v55, %v3223_v50  ;;  %v266_v0 = vsel %vm264_vm7, %v259_v56, %v3224_v49  ;;  %2904 = vmatprep.mubr.msk.bf16.mxu0 %vm395_vm8, %v272_v54 }
  0xcd   :  { %v3234_v60 = vunpack.i.h.bf16 %v3232_v59  ;;  %v3233_v61 = vunpack.i.l.bf16 %v3232_v59  ;;  %v271_v62 = vpack.c.bf16 %v266_v0, %v265_v1  ;;  %v501_v45 = vunpack.c.l.s4 %v3555_v44 }
  0xce   :  { %v247_v63 = vsel %vm243_vm4, %v3722_v16, %v3229_v57  ;;  %v246_v3 = vsel %vm243_vm4, %v3702_v2, %v3228_v58  ;;  %v3826_v46 = vrot.slane %v295_v41, %v3820_v40  ;;  %v3828_v47 = vrot.slane %v295_v41, %v303_v43 }
  0xcf   :  { %v253_v4 = vsel %vm250_vm5, %v246_v3, %v3233_v61  ;;  %v254_v5 = vsel %vm250_vm5, %v247_v63, %v3234_v60  ;;  %v3237_v6 = vpop.permute.xlu0 %3236  ;;  %444 = vmatmul.mubr.bf16.vlgmr.msra.gmra.mrb[0].mxu0 %v271_v62  ;;  %v3242_v9 = vpop.permute.xlu1 %3241  ;;  %v502_v49 = vunpack.c.0.s8 %v501_v45 }
  0xd0   :  { %v3239_v7 = vunpack.i.h.bf16 %v3237_v6  ;;  %v3238_v8 = vunpack.i.l.bf16 %v3237_v6  ;;  %v3244_v10 = vunpack.i.h.bf16 %v3242_v9  ;;  %v3243_v11 = vunpack.i.l.bf16 %v3242_v9 }
  0xd1   :  { %v3833_v58 = vsub.s32 %v502_v49, %v298_v39 }
  0xd2   :  { %v260_v12 = vsel %vm257_vm6, %v253_v4, %v3238_v8  ;;  %v261_v13 = vsel %vm257_vm6, %v254_v5, %v3239_v7  ;;  %v274_v14 = vpack.c.bf16 %v3244_v10, %v3243_v11 }
  0xd3   :  { %v3247_v16 = vpop.permute.xlu0 %3246  ;;  %v267_v15 = vsel %vm264_vm7, %v260_v12, %v3243_v11  ;;  %v268_v2 = vsel %vm264_vm7, %v261_v13, %v3244_v10  ;;  %v3252_v20 = vpop.permute.xlu1 %3251  ;;  %v3838_v12 = vsub.s32 2, %v298_v39 }
  0xd4   :  { %v3249_v18 = vunpack.i.h.bf16 %v3247_v16  ;;  %v3248_v19 = vunpack.i.l.bf16 %v3247_v16  ;;  %v273_v21 = vpack.c.bf16 %v268_v2, %v267_v15  ;;  %v3254_v22 = vunpack.i.h.bf16 %v3252_v20  ;;  %2905 = vmatprep.mubr.msk.bf16.mxu0 %vm395_vm8, %v274_v14 }
  0xd5   :  { %v3253_v23 = vunpack.i.l.bf16 %v3252_v20 }
  0xd6   :  { %v249_v24 = vsel %vm243_vm4, %v3748_v42, %v3249_v18  ;;  %v248_v25 = vsel %vm243_vm4, %v3727_v17, %v3248_v19  ;;  %vm1501_vm4 = vcmask 392192  }
  0xd7   :  { %v255_v26 = vsel %vm250_vm5, %v248_v25, %v3253_v23  ;;  %v256_v27 = vsel %vm250_vm5, %v249_v24, %v3254_v22  ;;  %v3257_v28 = vpop.permute.xlu0 %3256  ;;  %454 = vmatmul.mubr.bf16.gmra.mrb[4].mxu0 %v273_v21  ;;  %v3262_v31 = vpop.permute.xlu1 %3261  ;;  %vm1562_vm5 = vcmask 523264  }
  0xd8   :  { %v3259_v29 = vunpack.i.h.bf16 %v3257_v28  ;;  %v3258_v30 = vunpack.i.l.bf16 %v3257_v28  ;;  %v3264_v32 = vunpack.i.h.bf16 %v3262_v31  ;;  %v3263_v33 = vunpack.i.l.bf16 %v3262_v31 }
  0xda   :  { %v262_v34 = vsel %vm257_vm6, %v255_v26, %v3258_v30  ;;  %v263_v35 = vsel %vm257_vm6, %v256_v27, %v3259_v29  ;;  %v276_v36 = vpack.c.bf16 %v3264_v32, %v3263_v33  ;;  %vm1950_vm6 = vcmask 654336  }
  0xdb   :  { %v269_v42 = vsel %vm264_vm7, %v262_v34, %v3263_v33  ;;  %v270_v17 = vsel %vm264_vm7, %v263_v35, %v3264_v32  ;;  %vm3563_vm7 = vmmov 0  }
  0xdc   :  { %v275_v37 = vpack.c.bf16 %v270_v17, %v269_v42  ;;  %2906 = vmatprep.mubr.msk.bf16.mxu0 %vm395_vm8, %v276_v36 }
  0xdf   :  { %464 = vmatmul.mubr.bf16.gmra.mrb[8].mxu0 %v275_v37 }
 0x1a2   :  { %v445_v48 = vpop.f32.mrb[0].mxu0 }
 0x1a3   :  { %v446_v50 = vadd.f32 %v445_v48, %v3826_v46  ;;  %v447_v51 = vpop.f32.mrb[1].mxu0 }
 0x1a4   :  { %v448_v52 = vadd.f32 %v447_v51, %v3828_v47  ;;  %v449_v53 = vpop.f32.mrb[2].mxu0 }
 0x1a5   :  { %v474_v54 = vmax.f32 %v446_v50, 0.0  ;;  %v450_v55 = vadd.f32 %v449_v53, %v3826_v46  ;;  %v451_v56 = vpop.f32.mrb[3].mxu0 }
 0x1a6   :  { %v475_v57 = vmax.f32 %v448_v52, 0.0  ;;  %v452_v59 = vadd.f32 %v451_v56, %v3828_v47 }
 0x1a7   :  { %v476_v1 = vmax.f32 %v450_v55, 0.0 }
 0x1a8   :  { %v498_v0 = vcombine.low %v474_v54, %v475_v57  ;;  %v499_v60 = vcombine.high %v474_v54, %v475_v57  ;;  %v477_v61 = vmax.f32 %v452_v59, 0.0 }
 0x1aa   :  { %v506_v62 = vrot.slane %v498_v0, %v3833_v58  ;;  %v513_v63 = vrot.slane %v499_v60, %v3833_v58  ;;  %v516_v3 = vcombine.low %v476_v1, %v477_v61  ;;  %v517_v4 = vcombine.high %v476_v1, %v477_v61  ;;  %v455_v5 = vpop.f32.mrb[4].mxu0 }
 0x1ab   :  { %v457_v6 = vpop.f32.mrb[5].mxu0  ;;  %v456_v16 = vadd.f32 %v455_v5, %v3826_v46 }
 0x1ac   :  { %v514_v7 = vcombine.high %v506_v62, %v506_v62  ;;  %v515_v8 = vcombine.high %v513_v63, %v513_v63  ;;  %v2907_v9 = vrot.slane %v506_v62, 9  ;;  %v2909_v10 = vrot.slane %v513_v63, 9  ;;  %v459_v11 = vpop.f32.mrb[6].mxu0 }
 0x1ad   :  { %v524_v13 = vrot.slane %v516_v3, %v3833_v58  ;;  %v531_v14 = vrot.slane %v517_v4, %v3833_v58  ;;  %v461_v15 = vpop.f32.mrb[7].mxu0  ;;  %v458_v21 = vadd.f32 %v457_v6, %v3828_v47  ;;  %v478_v27 = vmax.f32 %v456_v16, 0.0 }
 0x1ae   :  { %v2908_v2 = vrot.slane %v514_v7, 9  ;;  %v2910_v18 = vrot.slane %v515_v8, 9  ;;  %v3843_v19 = vmax.f32 %v506_v62, %v2907_v9  ;;  %v3845_v20 = vmax.f32 %v513_v63, %v2909_v10 }
 0x1af   :  { %v532_v22 = vcombine.high %v524_v13, %v524_v13  ;;  %v3848_v23 = vcombine.high %v531_v14, %v531_v14  ;;  %v2911_v25 = vrot.slane %v524_v13, 9  ;;  %v2913_v26 = vrot.slane %v531_v14, 9 }
 0x1b0   :  { %v3850_v24 = vmax.f32 %v514_v7, %v2908_v2  ;;  %v3852_v28 = vmax.f32 %v515_v8, %v2910_v18  ;;  %v753_v29 = vrot.slane %v3843_v19, %v3820_v40  ;;  %v757_v30 = vrot.slane %v3843_v19, %v3838_v12 }
 0x1b1   :  { %v769_v31 = vrot.slane %v3845_v20, %v3820_v40  ;;  %v773_v33 = vrot.slane %v3845_v20, %v3838_v12  ;;  %v479_v34 = vmax.f32 %v458_v21, 0.0  ;;  %v460_v35 = vadd.f32 %v459_v11, %v3826_v46 }
 0x1b2   :  { %v465_v32 = vpop.f32.mrb[8].mxu0  ;;  %v462_v36 = vadd.f32 %v461_v15, %v3828_v47  ;;  %v2912_v17 = vrot.slane %v532_v22, 9  ;;  %v2914_v37 = vrot.slane %v3848_v23, 9  ;;  %v761_v50 = vrot.slane %v3850_v24, %v3820_v40 }
 0x1b3   :  { %v467_v42 = vpop.f32.mrb[9].mxu0  ;;  %v466_v38 = vadd.f32 %v465_v32, %v3826_v46  ;;  %v534_v43 = vcombine.low %v478_v27, %v479_v34  ;;  %v535_v44 = vcombine.high %v478_v27, %v479_v34  ;;  %v480_v45 = vmax.f32 %v460_v35, 0.0 }
 0x1b4   :  { %v468_v39 = vadd.f32 %v467_v42, %v3828_v47  ;;  %v469_v41 = vpop.f32.mrb[10].mxu0  ;;  %v481_v48 = vmax.f32 %v462_v36, 0.0  ;;  %v765_v59 = vrot.slane %v3850_v24, %v3838_v12  ;;  %v3874_v1 = vmax.f32 %v524_v13, %v2911_v25 }
 0x1b5   :  { %v471_v49 = vpop.f32.mrb[11].mxu0  ;;  %v482_v51 = vmax.f32 %v466_v38, 0.0  ;;  %v470_v53 = vadd.f32 %v469_v41, %v3826_v46  ;;  %v542_v54 = vrot.slane %v534_v43, %v3833_v58  ;;  %v549_v55 = vrot.slane %v535_v44, %v3833_v58 }
 0x1b6   :  { %v483_v52 = vmax.f32 %v468_v39, 0.0  ;;  %v552_v56 = vcombine.low %v480_v45, %v481_v48  ;;  %v553_v57 = vcombine.high %v480_v45, %v481_v48  ;;  %v3876_v61 = vmax.f32 %v532_v22, %v2912_v17 }
 0x1b7   :  { %v3878_v62 = vmax.f32 %v531_v14, %v2913_v26  ;;  %v550_v63 = vcombine.high %v542_v54, %v542_v54  ;;  %v472_v46 = vadd.f32 %v471_v49, %v3828_v47  ;;  %v3885_v7 = vcombine.high %v549_v55, %v549_v55 }
 0x1b8   :  { %v570_v0 = vcombine.low %v482_v51, %v483_v52  ;;  %v571_v60 = vcombine.high %v482_v51, %v483_v52  ;;  %v560_v3 = vrot.slane %v552_v56, %v3833_v58  ;;  %v567_v4 = vrot.slane %v553_v57, %v3833_v58 }
 0x1b9   :  { %v2915_v8 = vrot.slane %v542_v54, 9  ;;  %v2917_v9 = vrot.slane %v549_v55, 9  ;;  %v484_v10 = vmax.f32 %v470_v53, 0.0  ;;  %v2916_v47 = vrot.slane %v550_v63, 9 }
 0x1ba   :  { %v578_v5 = vrot.slane %v570_v0, %v3833_v58  ;;  %v585_v6 = vrot.slane %v571_v60, %v3833_v58  ;;  %v568_v11 = vcombine.high %v560_v3, %v560_v3  ;;  %v569_v13 = vcombine.high %v567_v4, %v567_v4 }
 0x1bb   :  { %v2919_v14 = vrot.slane %v560_v3, 9  ;;  %v2921_v16 = vrot.slane %v567_v4, 9  ;;  %v485_v26 = vmax.f32 %v472_v46, 0.0  ;;  %v3892_v34 = vmax.f32 %v3848_v23, %v2914_v37 }
 0x1bc   :  { %v586_v15 = vcombine.high %v578_v5, %v578_v5  ;;  %v587_v2 = vcombine.high %v585_v6, %v585_v6  ;;  %v2923_v18 = vrot.slane %v578_v5, 9  ;;  %v2920_v21 = vrot.slane %v568_v11, 9 }
 0x1bd   :  { %v2922_v22 = vrot.slane %v569_v13, 9  ;;  %v3887_v25 = vmax.f32 %v560_v3, %v2919_v14  ;;  %v3889_v27 = vmax.f32 %v567_v4, %v2921_v16  ;;  %v781_v35 = vrot.slane %v3852_v28, %v3838_v12 }
 0x1be   :  { %v2924_v32 = vrot.slane %v586_v15, 9  ;;  %v2918_v36 = vrot.slane %v3885_v7, 9  ;;  %v3897_v42 = vmax.f32 %v542_v54, %v2915_v8  ;;  %v3899_v17 = vmax.f32 %v549_v55, %v2917_v9 }
 0x1bf   :  { %v2925_v38 = vrot.slane %v585_v6, 9  ;;  %v3901_v39 = vmax.f32 %v550_v63, %v2916_v47  ;;  %v3903_v41 = vmax.f32 %v568_v11, %v2920_v21  ;;  %v2926_v43 = vrot.slane %v587_v2, 9 }
 0x1c0   :  { %v3905_v44 = vmax.f32 %v578_v5, %v2923_v18  ;;  %v3907_v23 = vmax.f32 %v569_v13, %v2922_v22  ;;  %v849_v37 = vrot.slane %v3887_v25, %v3820_v40  ;;  %v588_v45 = vcombine.low %v484_v10, %v485_v26 }
 0x1c1   :  { %v589_v48 = vcombine.high %v484_v10, %v485_v26  ;;  %v853_v49 = vrot.slane %v3887_v25, %v3838_v12  ;;  %v865_v51 = vrot.slane %v3889_v27, %v3820_v40  ;;  %v869_v52 = vrot.slane %v3889_v27, %v3838_v12 }
 0x1c2   :  { %v3917_v53 = vmax.f32 %v586_v15, %v2924_v32  ;;  %v3919_v54 = vmax.f32 %v585_v6, %v2925_v38  ;;  %v596_v55 = vrot.slane %v588_v45, %v3833_v58  ;;  %v956_v57 = vsel %vm942_vm9, %v765_v59, %v757_v30 }
 0x1c3   :  { %v3923_v56 = vrot.slane %v589_v48, %v3833_v58  ;;  %v857_v0 = vrot.slane %v3903_v41, %v3820_v40  ;;  %v861_v60 = vrot.slane %v3903_v41, %v3838_v12  ;;  %v789_v63 = vrot.slane %v3874_v1, %v3838_v12 }
 0x1c4   :  { %v957_v46 = vsel %vm944_vm10, %v773_v33, %v956_v57  ;;  %v604_v3 = vcombine.high %v596_v55, %v596_v55  ;;  %v797_v4 = vrot.slane %v3876_v61, %v3838_v12  ;;  %v805_v30 = vrot.slane %v3878_v62, %v3838_v12 }
 0x1c5   :  { %v813_v59 = vrot.slane %v3892_v34, %v3838_v12  ;;  %v958_v5 = vsel %vm946_vm11, %v781_v35, %v957_v46  ;;  %v777_v6 = vrot.slane %v3852_v28, %v3820_v40  ;;  %v785_v8 = vrot.slane %v3874_v1, %v3820_v40 }
 0x1c6   :  { %v943_v33 = vsel %vm942_vm9, %v761_v50, %v753_v29  ;;  %v3959_v9 = vcombine.high %v3923_v56, %v3923_v56  ;;  %v2927_v10 = vrot.slane %v596_v55, 9  ;;  %v793_v11 = vrot.slane %v3876_v61, %v3820_v40 }
 0x1c7   :  { %v801_v13 = vrot.slane %v3878_v62, %v3820_v40  ;;  %v2928_v14 = vrot.slane %v604_v3, 9  ;;  %v2929_v16 = vrot.slane %v3923_v56, 9  ;;  %v959_v47 = vsel %vm948_vm12, %v789_v63, %v958_v5 }
 0x1c8   :  { %v945_v29 = vsel %vm944_vm10, %v769_v31, %v943_v33  ;;  %v960_v50 = vsel %vm950_vm13, %v797_v4, %v959_v47  ;;  %v809_v15 = vrot.slane %v3892_v34, %v3820_v40  ;;  %v3975_v21 = vmax.f32 %v587_v2, %v2926_v43 }
 0x1c9   :  { %v947_v18 = vsel %vm946_vm11, %v777_v6, %v945_v29  ;;  %v961_v22 = vsel %vm952_vm14, %v805_v30, %v960_v50  ;;  %v877_v32 = vrot.slane %v3907_v23, %v3838_v12  ;;  %v885_v35 = vrot.slane %v3905_v44, %v3838_v12 }
 0x1ca   :  { %v949_v26 = vsel %vm948_vm12, %v785_v8, %v947_v18  ;;  %v962_v31 = vsel %vm954_vm15, %v813_v59, %v961_v22  ;;  %v893_v45 = vrot.slane %v3917_v53, %v3838_v12  ;;  %v976_v2 = vsel %vm942_vm9, %v861_v60, %v853_v49 }
 0x1cb   :  { %v951_v38 = vsel %vm950_vm13, %v793_v11, %v949_v26  ;;  %v3988_v43 = vmax.f32 %v596_v55, %v2927_v10  ;;  %v3990_v48 = vmax.f32 %v604_v3, %v2928_v14  ;;  %991 = vrot.lane.b32.xlu1 %v962_v31, %s3556_s2  ;;  %v977_v63 = vsel %vm944_vm10, %v869_v52, %v976_v2 }
 0x1cc   :  { %v953_v57 = vsel %vm952_vm14, %v801_v13, %v951_v38  ;;  %v901_v4 = vrot.slane %v3919_v54, %v3838_v12  ;;  %v978_v30 = vsel %vm946_vm11, %v877_v32, %v977_v63  ;;  %v881_v49 = vrot.slane %v3905_v44, %v3820_v40 }
 0x1cd   :  { %v955_v46 = vsel %vm954_vm15, %v809_v15, %v953_v57  ;;  %v979_v55 = vsel %vm948_vm12, %v885_v35, %v978_v30  ;;  %v873_v60 = vrot.slane %v3907_v23, %v3820_v40  ;;  %v889_v52 = vrot.slane %v3917_v53, %v3820_v40 }
 0x1ce   :  { %989 = vrot.lane.b32.xlu0 %v955_v46, %s3556_s2  ;;  %v969_v3 = vsel %vm942_vm9, %v857_v0, %v849_v37  ;;  %v909_v59 = vrot.slane %v3975_v21, %v3838_v12  ;;  %v980_v5 = vsel %vm950_vm13, %v893_v45, %v979_v55  ;;  %v825_v8 = vrot.slane %v3901_v39, %v3820_v40 }
 0x1cf   :  { %v970_v6 = vsel %vm944_vm10, %v865_v51, %v969_v3  ;;  %v981_v33 = vsel %vm952_vm14, %v901_v4, %v980_v5  ;;  %v897_v10 = vrot.slane %v3919_v54, %v3820_v40  ;;  %v817_v37 = vrot.slane %v3897_v42, %v3820_v40 }
 0x1d0   :  { %v971_v11 = vsel %vm946_vm11, %v873_v60, %v970_v6  ;;  %v982_v0 = vsel %vm954_vm15, %v909_v59, %v981_v33  ;;  %v821_v51 = vrot.slane %v3897_v42, %v3838_v12  ;;  %v829_v14 = vrot.slane %v3901_v39, %v3838_v12  ;;  %v3332_v33 = vld [vmem:[#allocation5 + $0x100] sm:$0xff]  }
 0x1d1   :  { %v972_v13 = vsel %vm948_vm12, %v881_v49, %v971_v11  ;;  %v2930_v47 = vrot.slane %v3959_v9, 9  ;;  %999 = vrot.lane.b32.xlu1 %v982_v0, %s3556_s2  ;;  %v905_v29 = vrot.slane %v3975_v21, %v3820_v40  ;;  %v963_v15 = vsel %vm942_vm9, %v825_v8, %v817_v37  ;;  %v3335_v37 = vld [vmem:[#allocation5] sm:$0xff]   ;;  %v3337_v0 = vld [vmem:[#allocation5 + $0x48] sm:$0xff]  }
 0x1d2   :  { %1014 = vrot.lane.b32.xlu0 %v955_v46, %s3557_s26  ;;  %v973_v50 = vsel %vm950_vm13, %v889_v52, %v972_v13  ;;  %v4037_v22 = vmax.f32 %v3885_v7, %v2918_v36  ;;  %v833_v26 = vrot.slane %v3899_v17, %v3820_v40  ;;  %v966_v32 = vsel %vm942_vm9, %v829_v14, %v821_v51  ;;  %v3333_v13 = vld [vmem:[#allocation5 + $0x108] sm:$0xff]   ;;  %v3340_v14 = vld [vmem:[#allocation5 + $0x50] sm:$0xff]  }
 0x1d3   :  { %v974_v18 = vsel %vm952_vm14, %v897_v10, %v973_v50  ;;  %v4043_v35 = vmax.f32 %v3923_v56, %v2929_v16  ;;  %v837_v38 = vrot.slane %v3899_v17, %v3838_v12  ;;  %v913_v2 = vrot.slane %v3988_v43, %v3820_v40  ;;  %v3334_v10 = vld [vmem:[#allocation5 + $0x40] sm:$0xff]   ;;  %v3338_v51 = vld [vmem:[#allocation5 + $0x8] sm:$0xff]   ;;  %v3343_v50 = vld [vmem:[#allocation5 + $0x58] sm:$0xff]  }
 0x1d4   :  { %v975_v31 = vsel %vm954_vm15, %v905_v29, %v974_v18  ;;  %v964_v45 = vsel %vm944_vm10, %v833_v26, %v963_v15  ;;  %v921_v7 = vrot.slane %v3990_v48, %v3820_v40  ;;  %v917_v56 = vrot.slane %v3988_v43, %v3838_v12  ;;  %3037 = vmatprep.subr.bf16.mxu1 %v3334_v10  ;;  %v3341_v29 = vld [vmem:[#allocation5 + $0x10] sm:$0xff]   ;;  %v3339_v15 = vld [vmem:[#allocation5 + $0x118] sm:$0xff]   ;;  %v3346_v26 = vld [vmem:[#allocation5 + $0x60] sm:$0xff]  }
 0x1d5   :  { %1018 = vrot.lane.b32.xlu1 %v975_v31, %s3557_s26  ;;  %v967_v36 = vsel %vm944_vm10, %v837_v38, %v966_v32  ;;  %v925_v16 = vrot.slane %v3990_v48, %v3838_v12  ;;  %v841_v57 = vrot.slane %v4037_v22, %v3820_v40  ;;  %v845_v63 = vrot.slane %v4037_v22, %v3838_v12  ;;  %v3344_v18 = vld [vmem:[#allocation5 + $0x18] sm:$0xff]   ;;  %v3342_v32 = vld [vmem:[#allocation5 + $0x120] sm:$0xff]   ;;  %v3349_v38 = vld [vmem:[#allocation5 + $0x68] sm:$0xff]  }
 0x1d6   :  { %997 = vrot.lane.b32.xlu0 %v975_v31, %s3556_s2  ;;  %v4065_v46 = vmax.f32 %v3959_v9, %v2930_v47  ;;  %v983_v4 = vsel %vm942_vm9, %v921_v7, %v913_v2  ;;  %v929_v30 = vrot.slane %v4043_v35, %v3820_v40  ;;  %v933_v49 = vrot.slane %v4043_v35, %v3838_v12  ;;  %v3336_v47 = vld [vmem:[#allocation5 + $0x110] sm:$0xff]   ;;  %v3347_v31 = vld [vmem:[#allocation5 + $0x20] sm:$0xff]   ;;  %v3350_v2 = vld [vmem:[#allocation5 + $0x28] sm:$0xff]  }
 0x1d7   :  { %v986_v55 = vsel %vm942_vm9, %v925_v16, %v917_v56  ;;  %v965_v60 = vsel %vm946_vm11, %v841_v57, %v964_v45  ;;  %v968_v52 = vsel %vm946_vm11, %v845_v63, %v967_v36  ;;  %v3558_v11 = vmov 0   ;;  %3038 = vmatpush3.bf16.msra.mxu1 %v3335_v37  ;;  %v3345_v45 = vld [vmem:[#allocation5 + $0x128] sm:$0xff]   ;;  %v3352_v7 = vld [vmem:[#allocation5 + $0x70] sm:$0xff]   ;;  %v3351_v56 = vld [vmem:[#allocation5 + $0x138] sm:$0xff]  }
 0x1d8   :  { %v984_v9 = vsel %vm944_vm10, %v929_v30, %v983_v4  ;;  %v987_v3 = vsel %vm944_vm10, %v933_v49, %v986_v55  ;;  %v937_v59 = vrot.slane %v4065_v46, %v3820_v40  ;;  %v941_v5 = vrot.slane %v4065_v46, %v3838_v12  ;;  %2036 = vmatprep.subr.bf16.mxu0 %v3558_v11  ;;  %v3348_v36 = vld [vmem:[#allocation5 + $0x130] sm:$0xff]  }
 0x1d9   :  { %995 = vrot.lane.b32.xlu1 %v968_v52, %s3556_s2  ;;  %2037 = vmatpush1.bf16.msra.mxu0 %v3332_v33 }
 0x1da   :  { %993 = vrot.lane.b32.xlu0 %v965_v60, %s3556_s2  ;;  %v985_v6 = vsel %vm946_vm11, %v937_v59, %v984_v9  ;;  %v988_v8 = vsel %vm946_vm11, %v941_v5, %v987_v3  ;;  %2038 = vmatprep.subr.bf16.mxu0 %v3558_v11 }
 0x1db   :  { %3039 = vmatprep.subr.bf16.mxu1 %v3337_v0 }
 0x1dc   :  { %3040 = vmatpush3.bf16.msra.mxu1 %v3338_v51 }
 0x1dd   :  { %1003 = vrot.lane.b32.xlu1 %v988_v8, %s3556_s2  ;;  %2039 = vmatpush1.bf16.msra.mxu0 %v3333_v13 }
 0x1de   :  { %1001 = vrot.lane.b32.xlu0 %v985_v6, %s3556_s2  ;;  %2040 = vmatprep.subr.bf16.mxu0 %v3558_v11  ;;  %s3564_s2 = smov [#allocation10]  }
 0x1df   :  { %3041 = vmatprep.subr.bf16.mxu1 %v3340_v14 }
 0x1e0   :  { %3042 = vmatpush3.bf16.msra.mxu1 %v3341_v29 }
 0x1e1   :  { %1020 = vrot.lane.b32.xlu1 %v985_v6, %s3557_s26  ;;  %2041 = vmatpush1.bf16.msra.mxu0 %v3336_v47 }
 0x1e2   :  { %1016 = vrot.lane.b32.xlu0 %v965_v60, %s3557_s26  ;;  %2042 = vmatprep.subr.bf16.mxu0 %v3558_v11  ;;  %s2874_s26 = sshll.u32 %s3564_s2, 4  ;;  %s2875_s26 = int_to_ptr.vmem [resolvable:$true] %s2874_s26 }
 0x1e3   :  { %3043 = vmatprep.subr.bf16.mxu1 %v3343_v50  ;;  %p3518_p5 = scmp.lt.s32.totalorder %s2875_s26, %s2875_s26 }
 0x1e4   :  { %3044 = vmatpush3.bf16.msra.mxu1 %v3344_v18 }
 0x1e5   :  { %2043 = vmatpush1.bf16.msra.mxu0 %v3339_v15  ;;  %3045 = vmatprep.subr.bf16.mxu1 %v3346_v26 }
 0x1e6   :  { %2044 = vmatprep.subr.bf16.mxu0 %v3558_v11 }
 0x1e8   :  { %3046 = vmatpush3.bf16.msra.mxu1 %v3347_v31 }
 0x1e9   :  { %2045 = vmatpush1.bf16.msra.mxu0 %v3342_v32  ;;  %3047 = vmatprep.subr.bf16.mxu1 %v3349_v38 }
 0x1ea   :  { %2046 = vmatprep.subr.bf16.mxu0 %v3558_v11 }
 0x1ec   :  { %3048 = vmatpush3.bf16.msra.mxu1 %v3350_v2 }
 0x1ed   :  { %2047 = vmatpush1.bf16.msra.mxu0 %v3345_v45  ;;  %3049 = vmatprep.subr.bf16.mxu1 %v3352_v7 }
 0x1ee   :  { %2048 = vmatprep.subr.bf16.mxu0 %v3558_v11 }
 0x1f1   :  { %2049 = vmatpush1.bf16.msra.mxu0 %v3348_v36 }
 0x1f2   :  { %2050 = vmatprep.subr.bf16.mxu0 %v3558_v11 }
 0x1f5   :  { %2051 = vmatpush1.bf16.msra.mxu0 %v3351_v56 }
 0x1f6   :  { %2052 = vmatprep.subr.bf16.mxu0 %v3558_v11 }
 0x23d   :  { %v992_v16 = vpop.permute.xlu1 %991 }
 0x240   :  { %v990_v57 = vpop.permute.xlu0 %989 }
 0x241   :  { %v1006_v30 = vsel %vm1005_vm0, %v990_v57, %v992_v16 }
 0x243   :  { %v1000_v4 = vpop.permute.xlu1 %999 }
 0x244   :  { %v1015_v63 = vpop.permute.xlu0 %1014 }
 0x245   :  { %v1027_v49 = vsel %vm1026_vm1, %v992_v16, %v1015_v63 }
 0x246   :  { %v1035_v55 = vcombine.low %v1006_v30, %v1027_v49  ;;  %v1036_v60 = vcombine.high %v1006_v30, %v1027_v49 }
 0x247   :  { %v1019_v59 = vpop.permute.xlu1 %1018 }
 0x248   :  { %v1043_v52 = vrot.slane %v1035_v55, %v3833_v58  ;;  %v1050_v9 = vrot.slane %v1036_v60, %v3833_v58  ;;  %v998_v3 = vpop.permute.xlu0 %997  ;;  %v1029_v6 = vsel %vm1026_vm1, %v1000_v4, %v1019_v59 }
 0x249   :  { %v1008_v5 = vsel %vm1005_vm0, %v998_v3, %v1000_v4 }
 0x24a   :  { %v1051_v8 = vcombine.high %v1043_v52, %v1043_v52  ;;  %v1052_v33 = vcombine.high %v1050_v9, %v1050_v9  ;;  %v1089_v10 = vrot.slane %v1043_v52, 1  ;;  %v1091_v37 = vrot.slane %v1050_v9, 1 }
 0x24b   :  { %v1125_v0 = vmax.f32 %v3843_v19, %v1043_v52  ;;  %v1129_v13 = vmax.f32 %v3874_v1, %v1050_v9  ;;  %v1062_v51 = vcombine.low %v1008_v5, %v1029_v6  ;;  %v1063_v14 = vcombine.high %v1008_v5, %v1029_v6  ;;  %v996_v26 = vpop.permute.xlu1 %995 }
 0x24c   :  { %v1090_v47 = vrot.slane %v1051_v8, 1  ;;  %v1092_v29 = vrot.slane %v1052_v33, 1  ;;  %v1126_v50 = vmax.f32 %v3850_v24, %v1089_v10  ;;  %v1127_v15 = vmax.f32 %v3845_v20, %v1051_v8  ;;  %v994_v18 = vpop.permute.xlu0 %993 }
 0x24d   :  { %v1130_v32 = vmax.f32 %v3876_v61, %v1091_v37  ;;  %v1131_v31 = vmax.f32 %v3878_v62, %v1052_v33  ;;  %v1168_v38 = vrot.slane %v1125_v0, %v3820_v40  ;;  %v1172_v19 = vrot.slane %v1125_v0, %v3838_v12 }
 0x24e   :  { %v1128_v1 = vmax.f32 %v3852_v28, %v1090_v47  ;;  %v1132_v45 = vmax.f32 %v3892_v34, %v1092_v29  ;;  %v1176_v2 = vrot.slane %v1126_v50, %v3820_v40  ;;  %v1180_v24 = vrot.slane %v1126_v50, %v3838_v12 }
 0x24f   :  { %v4117_v20 = vrot.slane %v1127_v15, %v3820_v40  ;;  %v4120_v7 = vrot.slane %v1127_v15, %v3838_v12  ;;  %v4123_v61 = vrot.slane %v1129_v13, %v3820_v40  ;;  %v4126_v62 = vrot.slane %v1129_v13, %v3838_v12  ;;  %v1004_v57 = vpop.permute.xlu1 %1003 }
 0x250   :  { %v4129_v28 = vrot.slane %v1128_v1, %v3820_v40  ;;  %v4132_v34 = vrot.slane %v1128_v1, %v3838_v12  ;;  %v4135_v36 = vrot.slane %v1130_v32, %v3820_v40  ;;  %v4138_v56 = vrot.slane %v1130_v32, %v3838_v12  ;;  %v1002_v16 = vpop.permute.xlu0 %1001 }
 0x251   :  { %v4141_v63 = vrot.slane %v1131_v31, %v3820_v40  ;;  %v4144_v4 = vrot.slane %v1131_v31, %v3838_v12  ;;  %v4147_v30 = vrot.slane %v1132_v45, %v3820_v40  ;;  %v4150_v49 = vrot.slane %v1132_v45, %v3838_v12 }
 0x252   :  { %v4153_v55 = vsel %vm942_vm9, %v1176_v2, %v1168_v38  ;;  %v4156_v60 = vsel %vm942_vm9, %v1180_v24, %v1172_v19  ;;  %v1343_v52 = vsel %vm942_vm9, %v4117_v20, %v1176_v2  ;;  %v4162_v9 = vsel %vm942_vm9, %v4120_v7, %v1180_v24 }
 0x253   :  { %v1404_v3 = vsel %vm942_vm9, %v4129_v28, %v4117_v20  ;;  %v1411_v59 = vsel %vm942_vm9, %v4132_v34, %v4120_v7  ;;  %v1070_v5 = vrot.slane %v1062_v51, %v3833_v58  ;;  %v1077_v6 = vrot.slane %v1063_v14, %v3833_v58  ;;  %v1021_v37 = vpop.permute.xlu1 %1020 }
 0x254   :  { %v1007_v8 = vsel %vm1005_vm0, %v994_v18, %v996_v26  ;;  %v1009_v33 = vsel %vm1005_vm0, %v1002_v16, %v1004_v57  ;;  %v1017_v10 = vpop.permute.xlu0 %1016  ;;  %v1405_v0 = vsel %vm944_vm10, %v4123_v61, %v1404_v3  ;;  %v1412_v13 = vsel %vm944_vm10, %v4126_v62, %v1411_v59 }
 0x255   :  { %v1078_v47 = vcombine.high %v1070_v5, %v1070_v5  ;;  %v1079_v29 = vcombine.high %v1077_v6, %v1077_v6  ;;  %v1095_v50 = vrot.slane %v1070_v5, 1  ;;  %v1097_v15 = vrot.slane %v1077_v6, 1 }
 0x256   :  { %v1137_v51 = vmax.f32 %v3887_v25, %v1070_v5  ;;  %v1141_v14 = vmax.f32 %v3905_v44, %v1077_v6  ;;  %v1028_v18 = vsel %vm1026_vm1, %v996_v26, %v1017_v10  ;;  %v1030_v32 = vsel %vm1026_vm1, %v1004_v57, %v1021_v37 }
 0x257   :  { %v1096_v31 = vrot.slane %v1078_v47, 1  ;;  %v1098_v38 = vrot.slane %v1079_v29, 1  ;;  %v1138_v19 = vmax.f32 %v3903_v41, %v1095_v50  ;;  %v1139_v1 = vmax.f32 %v3889_v27, %v1078_v47 }
 0x258   :  { %v1142_v45 = vmax.f32 %v3917_v53, %v1097_v15  ;;  %v1143_v2 = vmax.f32 %v3919_v54, %v1079_v29  ;;  %v1232_v24 = vrot.slane %v1137_v51, %v3820_v40  ;;  %v1236_v25 = vrot.slane %v1137_v51, %v3838_v12 }
 0x259   :  { %v1140_v44 = vmax.f32 %v3907_v23, %v1096_v31  ;;  %v1144_v26 = vmax.f32 %v3975_v21, %v1098_v38  ;;  %v1240_v16 = vrot.slane %v1138_v19, %v3820_v40  ;;  %v1244_v57 = vrot.slane %v1138_v19, %v3838_v12 }
 0x25a   :  { %v4193_v41 = vrot.slane %v1139_v1, %v3820_v40  ;;  %v4196_v27 = vrot.slane %v1139_v1, %v3838_v12  ;;  %v4199_v53 = vrot.slane %v1141_v14, %v3820_v40  ;;  %v4202_v54 = vrot.slane %v1141_v14, %v3838_v12 }
 0x25b   :  { %v4205_v23 = vrot.slane %v1140_v44, %v3820_v40  ;;  %v4208_v21 = vrot.slane %v1140_v44, %v3838_v12  ;;  %v4211_v3 = vrot.slane %v1142_v45, %v3820_v40  ;;  %v4214_v59 = vrot.slane %v1142_v45, %v3838_v12 }
 0x25c   :  { %v4217_v5 = vrot.slane %v1143_v2, %v3820_v40  ;;  %v4220_v6 = vrot.slane %v1143_v2, %v3838_v12  ;;  %v4223_v10 = vrot.slane %v1144_v26, %v3820_v40  ;;  %v4226_v37 = vrot.slane %v1144_v26, %v3838_v12 }
 0x25d   :  { %v4229_v47 = vsel %vm942_vm9, %v1240_v16, %v1232_v24  ;;  %v4232_v29 = vsel %vm942_vm9, %v1244_v57, %v1236_v25  ;;  %v1357_v50 = vsel %vm942_vm9, %v4193_v41, %v1240_v16  ;;  %v1364_v15 = vsel %vm942_vm9, %v4196_v27, %v1244_v57 }
 0x25e   :  { %v4241_v51 = vsel %vm942_vm9, %v4205_v23, %v4193_v41  ;;  %v4246_v14 = vsel %vm942_vm9, %v4208_v21, %v4196_v27  ;;  %v1053_v31 = vcombine.low %v1007_v8, %v1028_v18  ;;  %v1080_v38 = vcombine.low %v1009_v33, %v1030_v32  ;;  %v3354_v18 = vld [vmem:[#allocation5 + $0x140] sm:$0xff]   ;;  %v3355_v32 = vld [vmem:[#allocation5 + $0x78] sm:$0xff]  }
 0x25f   :  { %v1406_v19 = vsel %vm946_vm11, %v4135_v36, %v1405_v0  ;;  %v1413_v1 = vsel %vm946_vm11, %v4138_v56, %v1412_v13  ;;  %v1344_v45 = vsel %vm944_vm10, %v4129_v28, %v1343_v52  ;;  %v1358_v2 = vsel %vm944_vm10, %v4205_v23, %v1357_v50  ;;  %v3353_v0 = vld [vmem:[#allocation5 + $0x30] sm:$0xff]   ;;  %2053 = vmatpush1.bf16.msra.mxu0 %v3354_v18 }
 0x260   :  { %v1060_v24 = vrot.slane %v1053_v31, %v3833_v58  ;;  %v1087_v25 = vrot.slane %v1080_v38, %v3833_v58  ;;  %v1407_v8 = vsel %vm948_vm12, %v4141_v63, %v1406_v19  ;;  %v1414_v33 = vsel %vm948_vm12, %v4144_v4, %v1413_v1  ;;  %3050 = vmatpush3.bf16.msra.mxu1 %v3353_v0 }
 0x261   :  { %v1408_v13 = vsel %vm950_vm13, %v4147_v30, %v1407_v8  ;;  %v1415_v52 = vsel %vm950_vm13, %v4150_v49, %v1414_v33  ;;  %v1345_v44 = vsel %vm946_vm11, %v4123_v61, %v1344_v45  ;;  %v1359_v26 = vsel %vm946_vm11, %v4199_v53, %v1358_v2  ;;  %3051 = vmatprep.subr.bf16.mxu1 %v3355_v32  ;;  %v3357_v8 = vld [vmem:[#allocation5 + $0x148] sm:$0xff]  }
 0x262   :  { %v4270_v16 = vcombine.high %v1060_v24, %v1060_v24  ;;  %v1093_v57 = vrot.slane %v1060_v24, 1  ;;  %v1133_v50 = vmax.f32 %v3897_v42, %v1060_v24  ;;  %v4273_v31 = vcombine.high %v1087_v25, %v1087_v25  ;;  %2054 = vmatprep.subr.bf16.mxu0 %v3558_v11 }
 0x263   :  { %v1099_v38 = vrot.slane %v1087_v25, 1  ;;  %v1145_v19 = vmax.f32 %v3988_v43, %v1087_v25  ;;  %v1346_v1 = vsel %vm948_vm12, %v4135_v36, %v1345_v44  ;;  %v1360_v45 = vsel %vm948_vm12, %v4211_v3, %v1359_v26  ;;  %v3356_v25 = vld [vmem:[#allocation5 + $0x38] sm:$0xff]   ;;  %2055 = vmatpush1.bf16.msra.mxu0 %v3357_v8 }
 0x264   :  { %v1134_v2 = vmax.f32 %v3901_v39, %v1093_v57  ;;  %v4284_v42 = vmax.f32 %v3899_v17, %v4270_v16  ;;  %v4287_v24 = vrot.slane %v1133_v50, %v3820_v40  ;;  %v4290_v43 = vrot.slane %v1133_v50, %v3838_v12  ;;  %3052 = vmatpush3.bf16.msra.mxu1 %v3356_v25 }
 0x265   :  { %v1146_v33 = vmax.f32 %v3990_v48, %v1099_v38  ;;  %v4295_v0 = vmax.f32 %v4043_v35, %v4273_v31  ;;  %v4298_v39 = vrot.slane %v1145_v19, %v3820_v40  ;;  %v4301_v17 = vrot.slane %v1145_v19, %v3838_v12  ;;  %2056 = vmatprep.subr.bf16.mxu0 %v3558_v11 }
 0x266   :  { %v4304_v18 = vrot.slane %v1134_v2, %v3820_v40  ;;  %v4307_v32 = vrot.slane %v1134_v2, %v3838_v12  ;;  %v1409_v44 = vsel %vm952_vm14, %v4287_v24, %v1408_v13  ;;  %v1416_v48 = vsel %vm952_vm14, %v4290_v43, %v1415_v52  ;;  %v3358_v2 = vld [vmem:[#allocation5 + $0xc0] sm:$0xff]  }
 0x267   :  { %v1347_v35 = vsel %vm950_vm13, %v4141_v63, %v1346_v1  ;;  %v1361_v26 = vsel %vm950_vm13, %v4217_v5, %v1360_v45  ;;  %v1351_v57 = vsel %vm944_vm10, %v4132_v34, %v4162_v9  ;;  %v1365_v50 = vsel %vm944_vm10, %v4208_v21, %v1364_v15  ;;  %3059 = vmatprep.subr.bf16.mxu1 %v3358_v2 }
 0x268   :  { %v1410_v13 = vsel %vm954_vm15, %v4304_v18, %v1409_v44  ;;  %v1417_v52 = vsel %vm954_vm15, %v4307_v32, %v1416_v48  ;;  %v1348_v38 = vsel %vm952_vm14, %v4147_v30, %v1347_v35  ;;  %v1362_v19 = vsel %vm952_vm14, %v4223_v10, %v1361_v26 }
 0x269   :  { %v3270_v1 = vpack.i.bf16 %v1417_v52, %v1410_v13  ;;  %v1349_v9 = vsel %vm954_vm15, %v4287_v24, %v1348_v38  ;;  %v1363_v15 = vsel %vm954_vm15, %v4298_v39, %v1362_v19  ;;  %v1352_v45 = vsel %vm946_vm11, %v4126_v62, %v1351_v57  ;;  %v3360_v19 = vld [vmem:[#allocation5 + $0x150] sm:$0xff]  }
 0x26a   :  { %v3265_v25 = vpack.i.bf16 %v1363_v15, %v1349_v9  ;;  %v1353_v8 = vsel %vm948_vm12, %v4138_v56, %v1352_v45  ;;  %v1366_v44 = vsel %vm946_vm11, %v4202_v54, %v1365_v50  ;;  %v4342_v48 = vrot.slane %v1146_v33, %v3820_v40  ;;  %2057 = vmatpush1.bf16.msra.mxu0 %v3360_v19 }
 0x26b   :  { %3271 = vrot.lane.b32.xlu1 %v3270_v1, %s3559_s14  ;;  %v1354_v35 = vsel %vm950_vm13, %v4144_v4, %v1353_v8  ;;  %v1367_v26 = vsel %vm948_vm12, %v4214_v59, %v1366_v44  ;;  %v4350_v57 = vrot.slane %v1146_v33, %v3838_v12  ;;  %v1419_v13 = vsel %vm944_vm10, %v4199_v53, %v4241_v51 }
 0x26c   :  { %3266 = vrot.lane.b32.xlu0 %v3265_v25, %s3560_s15  ;;  %v1355_v50 = vsel %vm952_vm14, %v4150_v49, %v1354_v35  ;;  %v1368_v52 = vsel %vm950_vm13, %v4220_v6, %v1367_v26  ;;  %v1420_v38 = vsel %vm946_vm11, %v4211_v3, %v1419_v13  ;;  %v1426_v33 = vsel %vm944_vm10, %v4202_v54, %v4246_v14 }
 0x26d   :  { %v1356_v1 = vsel %vm954_vm15, %v4290_v43, %v1355_v50  ;;  %v1369_v51 = vsel %vm952_vm14, %v4226_v37, %v1368_v52  ;;  %v1421_v9 = vsel %vm948_vm12, %v4217_v5, %v1420_v38  ;;  %v1427_v15 = vsel %vm946_vm11, %v4214_v59, %v1426_v33  ;;  %2058 = vmatprep.subr.bf16.mxu0 %v3558_v11 }
 0x26e   :  { %v1370_v45 = vsel %vm954_vm15, %v4301_v17, %v1369_v51  ;;  %v1422_v14 = vsel %vm950_vm13, %v4223_v10, %v1421_v9  ;;  %v1428_v25 = vsel %vm948_vm12, %v4220_v6, %v1427_v15  ;;  %v4380_v8 = vrot.slane %v4284_v42, %v3838_v12 }
 0x26f   :  { %v3275_v44 = vpack.i.bf16 %v1370_v45, %v1356_v1  ;;  %v1423_v35 = vsel %vm952_vm14, %v4298_v39, %v1422_v14  ;;  %v1429_v2 = vsel %vm950_vm13, %v4226_v37, %v1428_v25  ;;  %v4388_v26 = vrot.slane %v4295_v0, %v3838_v12 }
 0x270   :  { %v1424_v13 = vsel %vm954_vm15, %v4342_v48, %v1423_v35  ;;  %v1430_v50 = vsel %vm952_vm14, %v4301_v17, %v1429_v2  ;;  %v1472_v52 = vsel %vm942_vm9, %v4126_v62, %v4132_v34  ;;  %v1486_v38 = vsel %vm942_vm9, %v4202_v54, %v4208_v21 }
 0x271   :  { %3276 = vrot.lane.b32.xlu1 %v3275_v44, %s3560_s15  ;;  %v1431_v33 = vsel %vm954_vm15, %v4350_v57, %v1430_v50  ;;  %v1473_v19 = vsel %vm944_vm10, %v4138_v56, %v1472_v52  ;;  %v1487_v1 = vsel %vm944_vm10, %v4214_v59, %v1486_v38  ;;  %v4409_v51 = vrot.slane %v4284_v42, %v3820_v40 }
 0x272   :  { %v3280_v9 = vpack.i.bf16 %v1431_v33, %v1424_v13  ;;  %v1474_v15 = vsel %vm946_vm11, %v4144_v4, %v1473_v19  ;;  %v1488_v45 = vsel %vm946_vm11, %v4220_v6, %v1487_v1  ;;  %v1460_v14 = vrot.slane %v4295_v0, %v3820_v40 }
 0x273   :  { %v1475_v25 = vsel %vm948_vm12, %v4150_v49, %v1474_v15  ;;  %v1489_v44 = vsel %vm948_vm12, %v4226_v37, %v1488_v45  ;;  %v1465_v42 = vsel %vm942_vm9, %v4123_v61, %v4129_v28  ;;  %v1479_v35 = vsel %vm942_vm9, %v4199_v53, %v4205_v23 }
 0x274   :  { %3281 = vrot.lane.b32.xlu0 %v3280_v9, %s3559_s14  ;;  %v1476_v2 = vsel %vm950_vm13, %v4290_v43, %v1475_v25  ;;  %v1490_v0 = vsel %vm950_vm13, %v4301_v17, %v1489_v44  ;;  %v1466_v13 = vsel %vm944_vm10, %v4135_v36, %v1465_v42  ;;  %v1480_v50 = vsel %vm944_vm10, %v4211_v3, %v1479_v35 }
 0x275   :  { %v1477_v52 = vsel %vm952_vm14, %v4307_v32, %v1476_v2  ;;  %v1491_v38 = vsel %vm952_vm14, %v4350_v57, %v1490_v0  ;;  %v1467_v33 = vsel %vm946_vm11, %v4141_v63, %v1466_v13  ;;  %v1481_v19 = vsel %vm946_vm11, %v4217_v5, %v1480_v50  ;;  %v3363_v2 = vld [vmem:[#allocation5 + $0x158] sm:$0xff]  }
 0x276   :  { %v1478_v1 = vsel %vm954_vm15, %v4380_v8, %v1477_v52  ;;  %v1492_v9 = vsel %vm954_vm15, %v4388_v26, %v1491_v38  ;;  %v1468_v15 = vsel %vm948_vm12, %v4147_v30, %v1467_v33  ;;  %v1482_v45 = vsel %vm948_vm12, %v4223_v10, %v1481_v19  ;;  %2059 = vmatpush1.bf16.msra.mxu0 %v3363_v2 }
 0x277   :  { %v3295_v25 = vpack.i.bf16 %v1492_v9, %v1478_v1  ;;  %v1469_v44 = vsel %vm950_vm13, %v4287_v24, %v1468_v15  ;;  %v1483_v42 = vsel %vm950_vm13, %v4298_v39, %v1482_v45  ;;  %v1100_v35 = vrot.slane %v4273_v31, 1  ;;  %2060 = vmatprep.subr.bf16.mxu0 %v3558_v11 }
 0x278   :  { %v1470_v0 = vsel %vm952_vm14, %v4304_v18, %v1469_v44  ;;  %v1484_v13 = vsel %vm952_vm14, %v4342_v48, %v1483_v42  ;;  %v1540_v50 = vsel %vm942_vm9, %v4211_v3, %v4199_v53  ;;  %v1547_v52 = vsel %vm942_vm9, %v4214_v59, %v4202_v54 }
 0x279   :  { %3296 = vrot.lane.b32.xlu1 %v3295_v25, %s3561_s16  ;;  %v1471_v31 = vsel %vm954_vm15, %v4409_v51, %v1470_v0  ;;  %v1485_v38 = vsel %vm954_vm15, %v1460_v14, %v1484_v13  ;;  %v1148_v33 = vmax.f32 %v4065_v46, %v1100_v35  ;;  %v1541_v19 = vsel %vm944_vm10, %v4217_v5, %v1540_v50  ;;  %v3366_v50 = vld [vmem:[#allocation5 + $0x160] sm:$0xff]  }
 0x27a   :  { %v3285_v1 = vpack.i.bf16 %v1485_v38, %v1471_v31  ;;  %v1542_v9 = vsel %vm946_vm11, %v4223_v10, %v1541_v19  ;;  %v1548_v15 = vsel %vm944_vm10, %v4220_v6, %v1547_v52  ;;  %v1094_v45 = vrot.slane %v4270_v16, 1  ;;  %2061 = vmatpush1.bf16.msra.mxu0 %v3366_v50 }
 0x27b   :  { %v1521_v25 = vrot.slane %v1148_v33, %v3820_v40  ;;  %v1525_v44 = vrot.slane %v1148_v33, %v3838_v12  ;;  %v1543_v46 = vsel %vm948_vm12, %v4298_v39, %v1542_v9  ;;  %v1549_v42 = vsel %vm946_vm11, %v4226_v37, %v1548_v15 }
 0x27c   :  { %3286 = vrot.lane.b32.xlu0 %v3285_v1, %s3561_s16  ;;  %v1544_v35 = vsel %vm950_vm13, %v4342_v48, %v1543_v46  ;;  %v1550_v16 = vsel %vm948_vm12, %v4301_v17, %v1549_v42  ;;  %v1136_v2 = vmax.f32 %v4037_v22, %v1094_v45  ;;  %v1526_v0 = vsel %vm942_vm9, %v4135_v36, %v4123_v61  ;;  %v3362_v42 = vld [vmem:[#allocation5 + $0x88] sm:$0xff]  }
 0x27d   :  { %v1545_v39 = vsel %vm952_vm14, %v1460_v14, %v1544_v35  ;;  %v1551_v13 = vsel %vm950_vm13, %v4350_v57, %v1550_v16  ;;  %v1527_v11 = vsel %vm944_vm10, %v4141_v63, %v1526_v0  ;;  %v1533_v48 = vsel %vm942_vm9, %v4138_v56, %v4126_v62  ;;  %v3364_v35 = vld [vmem:[#allocation5 + $0xd0] sm:$0xff]  }
 0x27e   :  { %v1546_v17 = vsel %vm954_vm15, %v1521_v25, %v1545_v39  ;;  %v1552_v22 = vsel %vm952_vm14, %v4388_v26, %v1551_v13  ;;  %v1513_v52 = vrot.slane %v1136_v2, %v3820_v40  ;;  %v1517_v14 = vrot.slane %v1136_v2, %v3838_v12  ;;  %v3365_v0 = vld [vmem:[#allocation5 + $0x90] sm:$0xff]   ;;  %v3367_v39 = vld [vmem:[#allocation5 + $0xd8] sm:$0xff]  }
 0x27f   :  { %v1553_v31 = vsel %vm954_vm15, %v1525_v44, %v1552_v22  ;;  %v1528_v57 = vsel %vm946_vm11, %v4147_v30, %v1527_v11  ;;  %v1534_v38 = vsel %vm944_vm10, %v4144_v4, %v1533_v48  ;;  %v1301_v33 = vsel %vm944_vm10, %v4120_v7, %v4156_v60  ;;  %v3359_v44 = vld [vmem:[#allocation5 + $0x80] sm:$0xff]   ;;  %v3368_v22 = vld [vmem:[#allocation5 + $0x98] sm:$0xff]  }
 0x280   :  { %v3300_v19 = vpack.i.bf16 %v1553_v31, %v1546_v17  ;;  %v1529_v26 = vsel %vm948_vm12, %v4287_v24, %v1528_v57  ;;  %v1535_v12 = vsel %vm946_vm11, %v4150_v49, %v1534_v38  ;;  %v1302_v1 = vsel %vm946_vm11, %v4132_v34, %v1301_v33  ;;  %v3369_v57 = vld [vmem:[#allocation5 + $0xe0] sm:$0xff]  }
 0x281   :  { %v1530_v9 = vsel %vm950_vm13, %v4304_v18, %v1529_v26  ;;  %v1536_v15 = vsel %vm948_vm12, %v4290_v43, %v1535_v12  ;;  %v1303_v7 = vsel %vm948_vm12, %v4126_v62, %v1302_v1  ;;  %v1315_v60 = vsel %vm944_vm10, %v4196_v27, %v4232_v29  ;;  %v3370_v1 = vld [vmem:[#allocation5 + $0xa0] sm:$0xff]  }
 0x282   :  { %3301 = vrot.lane.b32.xlu1 %v3300_v19, %s3544_s27  ;;  %v1531_v24 = vsel %vm952_vm14, %v4409_v51, %v1530_v9  ;;  %v1537_v34 = vsel %vm950_vm13, %v4307_v32, %v1536_v15  ;;  %v1304_v18 = vsel %vm950_vm13, %v4138_v56, %v1303_v7  ;;  %v1316_v43 = vsel %vm946_vm11, %v4208_v21, %v1315_v60  ;;  %v3371_v9 = vld [vmem:[#allocation5 + $0xe8] sm:$0xff]  }
 0x283   :  { %v1532_v62 = vsel %vm954_vm15, %v1513_v52, %v1531_v24  ;;  %v1538_v45 = vsel %vm952_vm14, %v4380_v8, %v1537_v34  ;;  %v1305_v27 = vsel %vm952_vm14, %v4144_v4, %v1304_v18  ;;  %v1317_v29 = vsel %vm948_vm12, %v4202_v54, %v1316_v43  ;;  %v3372_v7 = vld [vmem:[#allocation5 + $0xa8] sm:$0xff]   ;;  %v3373_v24 = vld [vmem:[#allocation5 + $0xf0] sm:$0xff]  }
 0x284   :  { %v1539_v51 = vsel %vm954_vm15, %v1517_v14, %v1538_v45  ;;  %v1306_v32 = vsel %vm954_vm15, %v4150_v49, %v1305_v27  ;;  %v1318_v56 = vsel %vm950_vm13, %v4214_v59, %v1317_v29  ;;  %v1294_v8 = vsel %vm944_vm10, %v4117_v20, %v4153_v55 }
 0x285   :  { %v3290_v21 = vpack.i.bf16 %v1539_v51, %v1532_v62  ;;  %v1319_v25 = vsel %vm952_vm14, %v4220_v6, %v1318_v56  ;;  %v1308_v4 = vsel %vm944_vm10, %v4193_v41, %v4229_v47  ;;  %v1295_v49 = vsel %vm946_vm11, %v4129_v28, %v1294_v8  ;;  %v3374_v56 = vld [vmem:[#allocation5 + $0xb0] sm:$0xff]  }
 0x286   :  { %v1320_v54 = vsel %vm954_vm15, %v4226_v37, %v1319_v25  ;;  %v1309_v59 = vsel %vm946_vm11, %v4205_v23, %v1308_v4  ;;  %v1296_v6 = vsel %vm948_vm12, %v4123_v61, %v1295_v49  ;;  %v3375_v25 = vld [vmem:[#allocation5 + $0xf8] sm:$0xff]  }
 0x287   :  { %3291 = vrot.lane.b32.xlu0 %v3290_v21, %s3544_s27  ;;  %v1310_v20 = vsel %vm948_vm12, %v4199_v53, %v1309_v59  ;;  %v1297_v55 = vsel %vm950_vm13, %v4135_v36, %v1296_v6 }
 0x288   :  { %v1311_v41 = vsel %vm950_vm13, %v4211_v3, %v1310_v20  ;;  %v1298_v28 = vsel %vm952_vm14, %v4141_v63, %v1297_v55 }
 0x289   :  { %v1312_v23 = vsel %vm952_vm14, %v4217_v5, %v1311_v41  ;;  %v1299_v37 = vsel %vm954_vm15, %v4147_v30, %v1298_v28  ;;  %v3376_v41 = vld [vmem:[#allocation5 + $0xb8] sm:$0xff]  }
 0x28a   :  { %v1313_v61 = vsel %vm954_vm15, %v4223_v10, %v1312_v23  ;;  %v3361_v10 = vld [vmem:[#allocation5 + $0xc8] sm:$0xff]  }
 0x28b   :  { %v1577_v47 = vpack.c.bf16 %v1313_v61, %v1299_v37  ;;  %v3377_v61 = vld [vmem:[%s4818_s5 + $0x40] sm:$0xff]  }
 0x2dd   :  { %v4591_v46 = vpop.permute.xlu1 %3271 }
 0x2de   :  { %v4581_v53 = vpop.permute.xlu0 %3266  ;;  %v3274_v13 = vunpack.i.h.bf16 %v4591_v46  ;;  %v3273_v11 = vunpack.i.l.bf16 %v4591_v46  ;;  %v3387_v46 = vld [vmem:[%s4818_s5 + $0xd0] sm:$0xff]  }
 0x2df   :  { %v3269_v36 = vunpack.i.h.bf16 %v4581_v53  ;;  %v3268_v3 = vunpack.i.l.bf16 %v4581_v53  ;;  %v3379_v53 = vld [vmem:[%s4818_s5 + $0xc0] sm:$0xff]  }
 0x2e0   :  { %v1441_v38 = vsel %vm1440_vm3, %v3273_v11, %v3274_v13  ;;  %3103 = vmatprep.subr.bf16.mxu0 %v3379_v53  ;;  %v3394_v13 = vld [vmem:[%s4818_s5 + $0x20] sm:$0xff]  }
 0x2e1   :  { %v1569_v63 = vsel %vm1379_vm2, %v1306_v32, %v3268_v3  ;;  %v1570_v5 = vsel %vm1379_vm2, %v1320_v54, %v3269_v36 }
 0x2e2   :  { %v1578_v30 = vpack.c.bf16 %v1570_v5, %v1569_v63  ;;  %v3383_v63 = vld [vmem:[%s4818_s5 + $0xc8] sm:$0xff]  }
 0x2e3   :  { %v3277_v2 = vpop.permute.xlu1 %3276  ;;  %v3382_v5 = vld [vmem:[%s4818_s5 + $0x8] sm:$0xff]  }
 0x2e4   :  { %1986 = vmatprep.mubr.bf16.mxu1 %v1578_v30  ;;  %v3279_v43 = vunpack.i.h.bf16 %v3277_v2  ;;  %v3278_v62 = vunpack.i.l.bf16 %v3277_v2  ;;  %v3384_v30 = vld [vmem:[%s4818_s5 + $0x88] sm:$0xff]   ;;  %v3390_v2 = vld [vmem:[%s4818_s5 + $0x18] sm:$0xff]  }
 0x2e5   :  { %1987 = vmatmul.mubr.bf16.vlgmr.msra.gmra.mrb[0].mxu1 %v1577_v47  ;;  %v3378_v47 = vld [vmem:[%s4818_s5] sm:$0xff]  }
 0x2e6   :  { %3060 = vmatpush3.bf16.msra.mxu1 %v3359_v44  ;;  %v4593_v16 = vpop.permute.xlu0 %3281  ;;  %v1380_v59 = vsel %vm1379_vm2, %v3268_v3, %v3278_v62  ;;  %v1381_v6 = vsel %vm1379_vm2, %v3269_v36, %v3279_v43  ;;  %v3380_v36 = vld [vmem:[%s4818_s5 + $0x80] sm:$0xff]   ;;  %v3381_v3 = vld [vmem:[%s4818_s5 + $0x48] sm:$0xff]   ;;  %v3385_v44 = vld [vmem:[%s4818_s5 + $0x50] sm:$0xff]  }
 0x2e7   :  { %3061 = vmatprep.subr.bf16.mxu1 %v3361_v10  ;;  %v3284_v48 = vunpack.i.h.bf16 %v4593_v16  ;;  %v3283_v50 = vunpack.i.l.bf16 %v4593_v16  ;;  %v1571_v28 = vsel %vm1440_vm3, %v1380_v59, %v3273_v11  ;;  %v3386_v10 = vld [vmem:[%s4818_s5 + $0x10] sm:$0xff]   ;;  %v3391_v16 = vld [vmem:[%s4818_s5 + $0xd8] sm:$0xff]  }
 0x2e9   :  { %v1442_v33 = vsel %vm1440_vm3, %v3283_v50, %v3284_v48  ;;  %v1572_v23 = vsel %vm1440_vm3, %v1381_v6, %v3283_v50 }
 0x2ea   :  { %3062 = vmatpush3.bf16.msra.mxu1 %v3362_v42  ;;  %v1579_v37 = vpack.c.bf16 %v1572_v23, %v1571_v28  ;;  %v3388_v42 = vld [vmem:[%s4818_s5 + $0x90] sm:$0xff]   ;;  %v3395_v23 = vld [vmem:[%s4818_s5 + $0xe0] sm:$0xff]  }
 0x2eb   :  { %3063 = vmatprep.subr.bf16.mxu1 %v3364_v35  ;;  %v3297_v52 = vpop.permute.xlu1 %3296  ;;  %v3389_v35 = vld [vmem:[%s4818_s5 + $0x58] sm:$0xff]  }
 0x2ec   :  { %v3299_v60 = vunpack.i.h.bf16 %v3297_v52  ;;  %v3298_v45 = vunpack.i.l.bf16 %v3297_v52 }
 0x2ee   :  { %v3287_v17 = vpop.permute.xlu0 %3286  ;;  %3064 = vmatpush3.bf16.msra.mxu1 %v3365_v0  ;;  %v3392_v0 = vld [vmem:[%s4818_s5 + $0x98] sm:$0xff]  }
 0x2ef   :  { %v3289_v14 = vunpack.i.h.bf16 %v3287_v17  ;;  %v3288_v31 = vunpack.i.l.bf16 %v3287_v17  ;;  %3065 = vmatprep.subr.bf16.mxu1 %v3367_v39  ;;  %v3393_v39 = vld [vmem:[%s4818_s5 + $0x60] sm:$0xff]  }
 0x2f1   :  { %v1573_v19 = vsel %vm1501_vm4, %v1441_v38, %v3288_v31  ;;  %v1574_v26 = vsel %vm1501_vm4, %v1442_v33, %v3289_v14  ;;  %v1503_v27 = vsel %vm1501_vm4, %v3289_v14, %v3299_v60  ;;  %v1502_v21 = vsel %vm1501_vm4, %v3288_v31, %v3298_v45  ;;  %v2931_v33 = vld [vmem:[%s4817_s4] ss:$0 sm:$0xff] }
 0x2f2   :  { %v1580_v12 = vpack.c.bf16 %v1574_v26, %v1573_v19  ;;  %3066 = vmatpush3.bf16.msra.mxu1 %v3368_v22 }
 0x2f3   :  { %3067 = vmatprep.subr.bf16.mxu1 %v3369_v57 }
 0x2f4   :  { %2027 = vmatprep.mubr.bf16.mxu1 %v1580_v12  ;;  %v3302_v15 = vpop.permute.xlu1 %3301 }
 0x2f5   :  { %v3304_v34 = vunpack.i.h.bf16 %v3302_v15  ;;  %v3303_v18 = vunpack.i.l.bf16 %v3302_v15 }
 0x2f6   :  { %3068 = vmatpush3.bf16.msra.mxu1 %v3370_v1 }
 0x2f7   :  { %3069 = vmatprep.subr.bf16.mxu1 %v3371_v9  ;;  %v1564_v8 = vsel %vm1562_vm5, %v3303_v18, %v3304_v34  ;;  %v1576_v4 = vsel %vm1562_vm5, %v1503_v27, %v3303_v18 }
 0x2f9   :  { %v3292_v29 = vpop.permute.xlu0 %3291 }
 0x2fa   :  { %v3294_v51 = vunpack.i.h.bf16 %v3292_v29  ;;  %v3293_v32 = vunpack.i.l.bf16 %v3292_v29  ;;  %3070 = vmatpush3.bf16.msra.mxu1 %v3372_v7 }
 0x2fb   :  { %3071 = vmatprep.subr.bf16.mxu1 %v3373_v24 }
 0x2fc   :  { %v1563_v54 = vsel %vm1562_vm5, %v3293_v32, %v3294_v51  ;;  %v1575_v49 = vsel %vm1562_vm5, %v1502_v21, %v3293_v32 }
 0x2fd   :  { %v1581_v20 = vpack.c.bf16 %v1576_v4, %v1575_v49  ;;  %v1582_v55 = vpack.c.bf16 %v1564_v8, %v1563_v54 }
 0x2fe   :  { %3072 = vmatpush3.bf16.msra.mxu1 %v3374_v56 }
 0x2ff   :  { %2977 = vmatprep.mubr.msk.bf16.mxu0 %vm1950_vm6, %v1582_v55  ;;  %3073 = vmatprep.subr.bf16.mxu1 %v3375_v25 }
 0x300   :  { %2069 = vmatmul.mubr.bf16.vlgmr.msra.gmra.mrb[12].mxu0 %v1581_v20 }
 0x301   :  { %3104 = vmatpush3.bf16.msra.mxu0 %v3380_v36 }
 0x302   :  { %3074 = vmatpush3.bf16.msra.mxu1 %v3376_v41  ;;  %3105 = vmatprep.subr.bf16.mxu0 %v3383_v63 }
 0x303   :  { %3081 = vmatprep.subr.bf16.mxu1 %v3377_v61 }
 0x305   :  { %2028 = vmatmul.mubr.bf16.vlgmr.msra.gmra.mrb[4].mxu1 %v1579_v37  ;;  %3106 = vmatpush3.bf16.msra.mxu0 %v3384_v30  ;;  %v3396_v37 = vld [vmem:[%s4818_s5 + $0xa0] sm:$0xff]  }
 0x306   :  { %3082 = vmatpush3.bf16.msra.mxu1 %v3378_v47  ;;  %3107 = vmatprep.subr.bf16.mxu0 %v3387_v46 }
 0x307   :  { %3083 = vmatprep.subr.bf16.mxu1 %v3381_v3 }
 0x309   :  { %3108 = vmatpush3.bf16.msra.mxu0 %v3388_v42  ;;  %v3397_v42 = vld [vmem:[%s4818_s5 + $0x68] sm:$0xff]  }
 0x30a   :  { %3084 = vmatpush3.bf16.msra.mxu1 %v3382_v5  ;;  %3109 = vmatprep.subr.bf16.mxu0 %v3391_v16  ;;  %v3399_v16 = vld [vmem:[%s4818_s5 + $0xe8] sm:$0xff]  }
 0x30b   :  { %3085 = vmatprep.subr.bf16.mxu1 %v3385_v44 }
 0x30d   :  { %3110 = vmatpush3.bf16.msra.mxu0 %v3392_v0 }
 0x30e   :  { %3086 = vmatpush3.bf16.msra.mxu1 %v3386_v10  ;;  %3111 = vmatprep.subr.bf16.mxu0 %v3395_v23 }
 0x30f   :  { %3087 = vmatprep.subr.bf16.mxu1 %v3389_v35  ;;  %v3398_v35 = vld [vmem:[%s4818_s5 + $0x28] sm:$0xff]  }
 0x311   :  { %3112 = vmatpush3.bf16.msra.mxu0 %v3396_v37 }
 0x312   :  { %3088 = vmatpush3.bf16.msra.mxu1 %v3390_v2  ;;  %3113 = vmatprep.subr.bf16.mxu0 %v3399_v16  ;;  %v3416_v16 = vld [vmem:[#allocation7 + $0x38] sm:$0xff]  }
 0x313   :  { %3089 = vmatprep.subr.bf16.mxu1 %v3393_v39 }
 0x316   :  { %3090 = vmatpush3.bf16.msra.mxu1 %v3394_v13 }
 0x317   :  { %3091 = vmatprep.subr.bf16.mxu1 %v3397_v42  ;;  %v3414_v42 = vld [vmem:[#allocation7 + $0x28] sm:$0xff]  }
 0x31a   :  { %3092 = vmatpush3.bf16.msra.mxu1 %v3398_v35  ;;  %v3415_v35 = vld [vmem:[#allocation7 + $0x30] sm:$0xff]  }
 0x3b8   :  { %v3053_v11 = vpop.f32.mrb[0].mxu1 }
 0x3b9   :  { %v3054_v48 = vpop.f32.mrb[1].mxu1 }
 0x3ba   :  { %v3055_v50 = vadd.f32 %v3054_v48, %v3053_v11  ;;  %v3056_v17 = vpop.f32.mrb[2].mxu1  ;;  %v3400_v11 = vld [vmem:[%s4818_s5 + $0xa8] sm:$0xff]   ;;  %v3401_v48 = vld [vmem:[%s4818_s5 + $0x70] sm:$0xff]  }
 0x3bb   :  { %v3057_v22 = vpop.f32.mrb[3].mxu1  ;;  %3114 = vmatpush3.bf16.msra.mxu0 %v3400_v11  ;;  %3093 = vmatprep.subr.bf16.mxu1 %v3401_v48  ;;  %v3421_v11 = vld [vmem:[#allocation8 + $0x20] sm:$0xff]   ;;  %v3422_v48 = vld [vmem:[#allocation8 + $0x28] sm:$0xff]  }
 0x3bc   :  { %v3058_v52 = vadd.f32 %v3057_v22, %v3056_v17  ;;  %v1989_v12 = vadd.f32 %v3055_v50, %v2931_v33 }
 0x3be   :  { %v1992_v7 = vadd.f32 %v3058_v52, %v2931_v33  ;;  %v3403_v52 = vld [vmem:[%s4818_s5 + $0xf0] sm:$0xff]  }
 0x3bf   :  { %v3404_v33 = vld [vmem:[%s4818_s5 + $0xb0] sm:$0xff]   ;;  %3115 = vmatprep.subr.bf16.mxu0 %v3403_v52 }
 0x3c0   :  { %3116 = vmatpush3.bf16.msra.mxu0 %v3404_v33 }
 0x3d3   :  { %v2070_v14 = vpop.f32.mrb[12].mxu0 }
 0x3d4   :  { %v2072_v31 = vpop.f32.mrb[13].mxu0 }
 0x3d5   :  { %v2073_v57 = vpop.f32.mrb[14].mxu0 }
 0x3d6   :  { %v2075_v38 = vpop.f32.mrb[15].mxu0 }
 0x3d8   :  { %v3075_v19 = vpop.f32.mrb[4].mxu1 }
 0x3d9   :  { %v3076_v26 = vpop.f32.mrb[5].mxu1 }
 0x3da   :  { %v3077_v1 = vadd.f32 %v3076_v26, %v3075_v19  ;;  %v3078_v9 = vpop.f32.mrb[6].mxu1  ;;  %v3405_v19 = vld [vmem:[%s4818_s5 + $0x78] sm:$0xff]  }
 0x3db   :  { %v3079_v15 = vpop.f32.mrb[7].mxu1 }
 0x3dc   :  { %v2030_v60 = vadd.f32 %v3077_v1, %v1989_v12  ;;  %v3080_v24 = vadd.f32 %v3079_v15, %v3078_v9  ;;  %v3407_v12 = vld [vmem:[%s4818_s5 + $0xf8] sm:$0xff]  }
 0x3dd   :  { %v3406_v9 = vld [vmem:[%s4818_s5 + $0x38] sm:$0xff]   ;;  %3117 = vmatprep.subr.bf16.mxu0 %v3407_v12 }
 0x3de   :  { %v2071_v34 = vadd.f32 %v2070_v14, %v2030_v60  ;;  %v2033_v18 = vadd.f32 %v3080_v24, %v1992_v7  ;;  %v3408_v15 = vld [vmem:[%s4818_s5 + $0xb8] sm:$0xff]   ;;  %v3562_v7 = vmov 0.0  }
 0x3df   :  { %3118 = vmatpush3.bf16.msra.mxu0 %v3408_v15 }
 0x3e0   :  { %v2077_v43 = vmax.f32 %v2071_v34, 0.0  ;;  %v2074_v62 = vadd.f32 %v2073_v57, %v2033_v18  ;;  %v3402_v57 = vld [vmem:[%s4818_s5 + $0x30] sm:$0xff]   ;;  %3163 = vmatprep.subr.bf16.mxu0 %v3562_v7 }
 0x3e1   :  { %3094 = vmatpush3.bf16.msra.mxu1 %v3402_v57 }
 0x3e2   :  { %v2081_v45 = vcombine.high %v2077_v43, %v2077_v43  ;;  %v2088_v27 = vrot.slane %v2077_v43, %v3833_v58  ;;  %v2078_v29 = vmax.f32 %v2074_v62, 0.0  ;;  %3095 = vmatprep.subr.bf16.mxu1 %v3405_v19 }
 0x3e4   :  { %v2095_v51 = vrot.slane %v2081_v45, %v3833_v58  ;;  %v2096_v32 = vcombine.high %v2088_v27, %v2088_v27  ;;  %v2978_v56 = vrot.slane %v2088_v27, 9  ;;  %v2098_v21 = vcombine.high %v2078_v29, %v2078_v29 }
 0x3e5   :  { %v2105_v25 = vrot.slane %v2078_v29, %v3833_v58  ;;  %3096 = vmatpush3.bf16.msra.mxu1 %v3406_v9 }
 0x3e6   :  { %v2979_v8 = vrot.slane %v2096_v32, 9  ;;  %v4677_v4 = vmax.f32 %v2088_v27, %v2978_v56  ;;  %v2112_v54 = vrot.slane %v2098_v21, %v3833_v58  ;;  %v2097_v49 = vcombine.high %v2095_v51, %v2095_v51  ;;  %3143 = vmatprep.subr.bf16.mxu1 %v3562_v7 }
 0x3e7   :  { %v2113_v59 = vcombine.high %v2105_v25, %v2105_v25  ;;  %v2982_v6 = vrot.slane %v2105_v25, 9  ;;  %v2980_v20 = vrot.slane %v2095_v51, 9 }
 0x3e8   :  { %v2981_v55 = vrot.slane %v2097_v49, 9  ;;  %v4680_v41 = vmax.f32 %v2096_v32, %v2979_v8  ;;  %v2114_v28 = vcombine.high %v2112_v54, %v2112_v54  ;;  %v2984_v36 = vrot.slane %v2112_v54, 9 }
 0x3e9   :  { %v2983_v61 = vrot.slane %v2113_v59, 9  ;;  %v4688_v47 = vmax.f32 %v2105_v25, %v2982_v6  ;;  %v4690_v53 = vmax.f32 %v2095_v51, %v2980_v20  ;;  %v2166_v63 = vrot.slane %v4677_v4, %v3820_v40 }
 0x3ea   :  { %v4692_v3 = vmax.f32 %v2097_v49, %v2981_v55  ;;  %v2170_v5 = vrot.slane %v4680_v41, %v3820_v40  ;;  %v2985_v30 = vrot.slane %v2114_v28, 9  ;;  %v4700_v10 = vmax.f32 %v2112_v54, %v2984_v36  ;;  %v3409_v36 = vld [vmem:[#allocation7] sm:$0xff]  }
 0x3eb   :  { %v2174_v44 = vrot.slane %v4690_v53, %v3820_v40  ;;  %v2152_v46 = vmax.f32 %v2113_v59, %v2983_v61  ;;  %v2182_v13 = vrot.slane %v4688_v47, %v3820_v40 }
 0x3ec   :  { %v2178_v2 = vrot.slane %v4692_v3, %v3820_v40  ;;  %v2195_v0 = vsel %vm942_vm9, %v2170_v5, %v2166_v63  ;;  %v2154_v39 = vmax.f32 %v2114_v28, %v2985_v30  ;;  %v2190_v22 = vrot.slane %v4700_v10, %v3820_v40 }
 0x3ed   :  { %v2196_v50 = vsel %vm944_vm10, %v2174_v44, %v2195_v0  ;;  %v2186_v17 = vrot.slane %v2152_v46, %v3820_v40  ;;  %v3410_v44 = vld [vmem:[#allocation7 + $0x8] sm:$0xff]  }
 0x3ee   :  { %v2197_v14 = vsel %vm946_vm11, %v2178_v2, %v2196_v50  ;;  %v2194_v31 = vrot.slane %v2154_v39, %v3820_v40  ;;  %v3417_v2 = vld [vmem:[#allocation8] sm:$0xff]   ;;  %v3418_v0 = vld [vmem:[#allocation8 + $0x8] sm:$0xff]  }
 0x3ef   :  { %2201 = vrot.lane.b32.xlu0 %v2197_v14, %s3554_s12  ;;  %v2198_v38 = vsel %vm942_vm9, %v2186_v17, %v2182_v13  ;;  %v3420_v13 = vld [vmem:[#allocation8 + $0x18] sm:$0xff]   ;;  %v2986_v17 = vld [vmem:[%s4819_s6] ss:$0 sm:$0xff] }
 0x3f0   :  { %v2199_v26 = vsel %vm944_vm10, %v2190_v22, %v2198_v38 }
 0x3f1   :  { %v2200_v1 = vsel %vm946_vm11, %v2194_v31, %v2199_v26 }
 0x3f2   :  { %2203 = vrot.lane.b32.xlu1 %v2200_v1, %s3554_s12 }
 0x461   :  { %v2202_v60 = vpop.permute.xlu0 %2201 }
 0x462   :  { %v2215_v24 = vrot.slane %v2202_v60, %v3833_v58  ;;  %v3423_v60 = vld [vmem:[#allocation8 + $0x30] sm:$0xff]  }
 0x464   :  { %v2216_v34 = vcombine.high %v2215_v24, %v2215_v24  ;;  %v2225_v18 = vrot.slane %v2215_v24, 1  ;;  %v2204_v43 = vpop.permute.xlu1 %2203  ;;  %v2237_v27 = vmax.f32 %v4677_v4, %v2215_v24  ;;  %v3424_v24 = vld [vmem:[#allocation8 + $0x38] sm:$0xff]  }
 0x465   :  { %v2223_v62 = vrot.slane %v2204_v43, %v3833_v58 }
 0x466   :  { %v2226_v45 = vrot.slane %v2216_v34, 1  ;;  %v2238_v29 = vmax.f32 %v4680_v41, %v2225_v18  ;;  %v2239_v21 = vmax.f32 %v4690_v53, %v2216_v34  ;;  %v2250_v58 = vrot.slane %v2237_v27, %v3820_v40  ;;  %v3019_v34 = vld [vmem:[%s4821_s8] ss:$0 sm:$0xff]  ;;  %s3513_s8 = scalar_lea.vmem %s2875_s26, 32 }
 0x467   :  { %v2224_v51 = vcombine.high %v2223_v62, %v2223_v62  ;;  %v2227_v32 = vrot.slane %v2223_v62, 1  ;;  %v2241_v56 = vmax.f32 %v4688_v47, %v2223_v62  ;;  %p3514_p4 = scmp.ne.s32.totalorder %s2875_s26, %s3513_s8  ;;  %p3519_p6 = scmp.lt.s32.totalorder %s3513_s8, %s3513_s8 }
 0x468   :  { %v2240_v25 = vmax.f32 %v4692_v3, %v2226_v45  ;;  %v2262_v20 = vrot.slane %v2238_v29, %v3820_v40  ;;  %v2274_v41 = vrot.slane %v2239_v21, %v3820_v40 }
 0x469   :  { %v2228_v8 = vrot.slane %v2224_v51, 1  ;;  %v2242_v54 = vmax.f32 %v2152_v46, %v2227_v32  ;;  %v2243_v49 = vmax.f32 %v4700_v10, %v2224_v51  ;;  %v2254_v59 = vrot.slane %v2241_v56, %v3820_v40  ;;  %v3411_v46 = vld [vmem:[#allocation7 + $0x10] sm:$0xff]   ;;  %v3413_v10 = vld [vmem:[#allocation7 + $0x20] sm:$0xff]   ;;  %v3028_v32 = vld [vmem:[%s4823_s10] ss:$0 sm:$0xff]  ;;  %p3520_p7 = por %p3519_p6, %p3518_p5 }
 0x46a   :  { %v2286_v37 = vrot.slane %v2240_v25, %v3820_v40 }
 0x46b   :  { %v2244_v6 = vmax.f32 %v2154_v39, %v2228_v8  ;;  %v2278_v4 = vrot.slane %v2243_v49, %v3820_v40  ;;  %v2266_v55 = vrot.slane %v2242_v54, %v3820_v40  ;;  %v2255_v28 = vsel %vm942_vm9, %v2254_v59, %v2250_v58  ;;  %v3419_v39 = vld [vmem:[#allocation8 + $0x10] sm:$0xff]   ;;  %p3521_p8 = pnand %p3520_p7, %p3514_p4 }
 0x46c   :  { %v2293_v3 = vpack.c.bf16 %v2255_v28, %v2255_v28 }
 0x46d   :  { %v2267_v23 = vsel %vm942_vm9, %v2266_v55, %v2262_v20  ;;  %v2290_v61 = vrot.slane %v2244_v6, %v3820_v40  ;;  %v2279_v53 = vsel %vm942_vm9, %v2278_v4, %v2274_v41  ;;  %v3412_v40 = vld [vmem:[#allocation7 + $0x18] sm:$0xff]  }
 0x46e   :  { %v2294_v47 = vpack.c.bf16 %v2267_v23, %v2267_v23  ;;  %v2295_v30 = vpack.c.bf16 %v2279_v53, %v2279_v53 }
 0x46f   :  { %v2291_v63 = vsel %vm942_vm9, %v2290_v61, %v2286_v37 }
 0x470   :  { %2592 = vmatprep.mubr.bf16.mxu1 %v2294_v47  ;;  %v2296_v5 = vpack.c.bf16 %v2291_v63, %v2291_v63 }
 0x471   :  { %2593 = vmatmul.mubr.bf16.vlgmr.msra.gmra.mrb[8].mxu1 %v2293_v3 }
 0x472   :  { %2632 = vmatprep.mubr.bf16.mxu0 %v2296_v5  ;;  %3144 = vmatpush3.bf16.msra.mxu1 %v3409_v36 }
 0x473   :  { %2633 = vmatmul.mubr.bf16.vlgmr.msra.gmra.mrb[16].mxu0 %v2295_v30  ;;  %3145 = vmatprep.subr.bf16.mxu1 %v3562_v7 }
 0x474   :  { %3159 = vmatprep.mubr.msk.bf16.mxu1 %vm3563_vm7, %v3562_v7  ;;  %3179 = vmatprep.mubr.msk.bf16.mxu0 %vm3563_vm7, %v3562_v7 }
 0x475   :  { %3164 = vmatpush3.bf16.msra.mxu0 %v3417_v2 }
 0x476   :  { %3146 = vmatpush3.bf16.msra.mxu1 %v3410_v44  ;;  %3165 = vmatprep.subr.bf16.mxu0 %v3562_v7 }
 0x477   :  { %3147 = vmatprep.subr.bf16.mxu1 %v3562_v7 }
 0x479   :  { %3166 = vmatpush3.bf16.msra.mxu0 %v3418_v0 }
 0x47a   :  { %3148 = vmatpush3.bf16.msra.mxu1 %v3411_v46  ;;  %3167 = vmatprep.subr.bf16.mxu0 %v3562_v7 }
 0x47b   :  { %3149 = vmatprep.subr.bf16.mxu1 %v3562_v7 }
 0x47d   :  { %3168 = vmatpush3.bf16.msra.mxu0 %v3419_v39 }
 0x47e   :  { %3150 = vmatpush3.bf16.msra.mxu1 %v3412_v40  ;;  %3169 = vmatprep.subr.bf16.mxu0 %v3562_v7 }
 0x47f   :  { %3151 = vmatprep.subr.bf16.mxu1 %v3562_v7 }
 0x481   :  { %3170 = vmatpush3.bf16.msra.mxu0 %v3420_v13 }
 0x482   :  { %3152 = vmatpush3.bf16.msra.mxu1 %v3413_v10  ;;  %3171 = vmatprep.subr.bf16.mxu0 %v3562_v7 }
 0x483   :  { %3153 = vmatprep.subr.bf16.mxu1 %v3562_v7 }
 0x485   :  { %3172 = vmatpush3.bf16.msra.mxu0 %v3421_v11 }
 0x486   :  { %3154 = vmatpush3.bf16.msra.mxu1 %v3414_v42  ;;  %3173 = vmatprep.subr.bf16.mxu0 %v3562_v7 }
 0x487   :  { %3155 = vmatprep.subr.bf16.mxu1 %v3562_v7 }
 0x489   :  { %3174 = vmatpush3.bf16.msra.mxu0 %v3422_v48 }
 0x48a   :  { %3156 = vmatpush3.bf16.msra.mxu1 %v3415_v35  ;;  %3175 = vmatprep.subr.bf16.mxu0 %v3562_v7 }
 0x48b   :  { %3157 = vmatprep.subr.bf16.mxu1 %v3562_v7 }
 0x48d   :  { %3176 = vmatpush3.bf16.msra.mxu0 %v3423_v60 }
 0x48e   :  { %3158 = vmatpush3.bf16.msra.mxu1 %v3416_v16  ;;  %3177 = vmatprep.subr.bf16.mxu0 %v3562_v7 }
 0x491   :  { %3178 = vmatpush3.bf16.msra.mxu0 %v3424_v24 }
 0x544   :  { %v3097_v50 = vpop.f32.mrb[8].mxu1 }
 0x545   :  { %v3098_v22 = vpop.f32.mrb[9].mxu1 }
 0x546   :  { %v3099_v52 = vadd.f32 %v3098_v22, %v3097_v50  ;;  %v3100_v14 = vpop.f32.mrb[10].mxu1  ;;  %v3119_v31 = vpop.f32.mrb[16].mxu0 }
 0x547   :  { %v3101_v57 = vpop.f32.mrb[11].mxu1  ;;  %v3120_v38 = vpop.f32.mrb[17].mxu0 }
 0x548   :  { %v2595_v33 = vadd.f32 %v3099_v52, %v2986_v17  ;;  %v3121_v19 = vadd.f32 %v3120_v38, %v3119_v31  ;;  %v3122_v26 = vpop.f32.mrb[18].mxu0 }
 0x549   :  { %v3123_v12 = vpop.f32.mrb[19].mxu0 }
 0x54a   :  { %v2635_v1 = vadd.f32 %v3121_v19, %v2595_v33 }
 0x54c   :  { %v2640_v9 = vmax.f32 %v2635_v1, 0.0 }
 0x54e   :  { %v2641_v15 = vpack.c.bf16 %v2640_v9, %v2640_v9 }
 0x550   :  { %3160 = vmatmul.mubr.bf16.vlgmr.msra.gmra.mrb[12].mxu1 %v2641_v15 }
 0x623   :  { %v2747_v18 = vpop.f32.mrb[12].mxu1 }
 0x624   :  { %v2748_v43 = vadd.f32 %v3019_v34, %v2747_v18  ;;  %v3161_v62 = vpop.f32.mrb[13].mxu1 }
 0x625   :  { %v2750_v45 = vpop.f32.mrb[14].mxu1 }
 0x626   :  { %v2753_v27 = vmax.f32 %v2748_v43, 0.0  ;;  %v3162_v29 = vpop.f32.mrb[15].mxu1 }
 0x628   :  { %v2754_v51 = vpack.c.bf16 %v2753_v27, %v2753_v27 }
 0x62a   :  { %3180 = vmatmul.mubr.bf16.vlgmr.msra.gmra.mrb[20].mxu0 %v2754_v51 }
 0x6fd   :  { %v2860_v56 = vpop.f32.mrb[20].mxu0 }
 0x6fe   :  { %v2861_v7 = vadd.f32 %v3028_v32, %v2860_v56  ;;  %v3181_v21 = vpop.f32.mrb[21].mxu0 }
 0x6ff   :  { %v2863_v25 = vpop.f32.mrb[22].mxu0 }
 0x700   :  { %v2866_v8 = vmax.f32 %v2861_v7, 0.0  ;;  %v3182_v54 = vpop.f32.mrb[23].mxu0 }
 0x702   :  { %2867 = vst [vmem:[#allocation10] sm:$0x3] %v2866_v8 }
 0x703   :  { %3524 = shalt.err (!%p3521_p8)
}
 0x704   :  { %s3525_s10 = scalar_lea.hbm %s4824_s11, 32 }
 0x705   :  { %p3526_p9 = scmp.ne.s32.totalorder %s4824_s11, %s3525_s10  ;;  %p3529_p10 = scmp.lt.u32.totalorder %s3525_s10, %s4824_s11 }
 0x707   :  { %p3531_p11 = pnand %p3529_p10, %p3526_p9 }
 0x709   :  { %3534 = shalt.err (!%p3531_p11)
}
 0x70a   :  { %2877 = dma.vmem_to_hbm [thread:$0]  %s2875_s26, 32, %s4824_s11, [#allocation4]  }
 0x70b   :  { %3541 = dma.done.wait [#allocation4], 32  }
 0x70c   :  { %3542 = vsyncadd [#allocation4], 4294967264 }
 0x70d   :  { %2881 = vsyncpa [#allocation3], 1 }
 0x70e   :  { %2882 = vsyncpa [#allocation6], 1 }
 0x70f   :  { %2883 = vsyncpa [#allocation9], 1 }
 0x710   :  { %2884 = vsyncpa [#allocation4], 1 }

</bundles_post_ra>
